<compile_context>
chip_gen: v6e
topology: v6e:2x2x1
jax: 0.10.0
libtpu: 0.0.40
codegen_flags: <defaults>
</compile_context>

<pallas_src>
import jax
import jax.numpy as jnp
from jax import lax
from jax.experimental import pallas as pl
from jax.experimental.pallas import tpu as pltpu


def submodel_kernel(xproj_ref, whh0_ref, wih1_ref, whh1_ref, b1_ref,
                    wf_ref, bf_ref, out_ref, h1all_sc):
    """Single-invocation kernel; all operands resident in VMEM.

    xproj_ref: (T, B, 4H) f32   precomputed x_seq @ Wih0 + b0 (pad steps = b0)
    whh0:      (H, 4H)   bf16   layer-0 W_hh^T          (PyTorch gate order i,f,g,o)
    wih1:      (H, 4H)   bf16   layer-1 W_ih^T
    whh1:      (H, 4H)   bf16   layer-1 W_hh^T
    b1:        (1, 4H)   f32    layer-1 b_ih + b_hh
    wf/bf:     (H, C) bf16 / (1, C) f32   fc1
    out_ref:   (digital*B, C) f32   softmax probs for the last `digital` steps
    h1all_sc:  (digital*B, H) f32   kept layer-1 hidden states
    """
    T, B, G = xproj_ref.shape
    H = whh0_ref.shape[0]
    n_keep = out_ref.shape[0] // B          # = digital
    l_skip = T - n_keep                     # first timestep whose h1 feeds fc1

    # Hoisted weight loads / bias broadcast (JAX does not CSE broadcast_in_dim).
    whh0 = whh0_ref[...]
    wih1 = wih1_ref[...]
    whh1 = whh1_ref[...]
    b1b = jnp.broadcast_to(b1_ref[...], (B, G))

    zeros = jnp.zeros((B, H), jnp.float32)

    def step(t, carry):
        h0, c0, h1, c1 = carry

        # Layer-1 recurrent projection issued first: depends only on h1_prev, so it
        # overlaps with layer-0's activations in the unrolled schedule.
        rec1 = jnp.dot(h1.astype(jnp.bfloat16), whh1,
                       preferred_element_type=jnp.float32)

        # ---- layer 0 (input projection + b0 precomputed in the wrapper).
        g0 = xproj_ref[t] + jnp.dot(h0.astype(jnp.bfloat16), whh0,
                                    preferred_element_type=jnp.float32)
        sg0 = jax.nn.sigmoid(g0)            # one EUP pass over the whole (B,4H) slab
        th0 = jnp.tanh(g0)
        c0 = sg0[:, H:2 * H] * c0 + sg0[:, 0:H] * th0[:, 2 * H:3 * H]
        h0 = sg0[:, 3 * H:4 * H] * jnp.tanh(c0)

        # ---- layer 1.
        g1 = jnp.dot(h0.astype(jnp.bfloat16), wih1,
                     preferred_element_type=jnp.float32) + rec1 + b1b
        sg1 = jax.nn.sigmoid(g1)
        th1 = jnp.tanh(g1)
        c1 = sg1[:, H:2 * H] * c1 + sg1[:, 0:H] * th1[:, 2 * H:3 * H]
        h1 = sg1[:, 3 * H:4 * H] * jnp.tanh(c1)

        # Only the last `digital` hidden states feed fc1/softmax (scratch rows
        # 0..digital*B-1 are exactly the written rows).
        @pl.when(t >= l_skip)
        def _():
            row = pl.multiple_of((t - l_skip) * B, B)   # sublane-aligned store
            h1all_sc[pl.ds(row, B), :] = h1

        return (h0, c0, h1, c1)

    # Short static trip count -> fully unroll so the scheduler sees across steps.
    lax.fori_loop(0, T, step, (zeros, zeros, zeros, zeros), unroll=True)

    # ---------- Epilogue: fc1 + softmax over just the kept (digital*B) rows.
    logits = jnp.dot(h1all_sc[...].astype(jnp.bfloat16), wf_ref[...],
                     preferred_element_type=jnp.float32) + bf_ref[...]
    m = jnp.max(logits, axis=-1, keepdims=True)
    e = jnp.exp(logits - m)
    inv = pl.reciprocal(jnp.sum(e, axis=-1, keepdims=True), approx=True)
    out_ref[...] = (e * inv).astype(out_ref.dtype)


def submodel_forward(x, params, digital):
    """x: (B, L, C) one-hot float32.  Returns (B, digital, C) softmax probs."""
    B, L, C = x.shape
    H = params["whh0"].shape[0]
    T = L + digital

    # x is one-hot and the appended padding steps are all-zero, so the layer-0 input
    # projection x_seq @ Wih0 + b0 is a trivial gather / bias broadcast.  Compute it
    # here (cheap XLA op) and pass the time-major (T, B, 4H) projection to the kernel.
    xproj_real = jnp.einsum('blc,cg->lbg', x, params["wih0"]) + params["b0"]   # (L,B,4H)
    xproj_pad = jnp.broadcast_to(params["b0"], (digital, B, 4 * H))            # pad = b0
    xproj = jnp.concatenate([xproj_real, xproj_pad], axis=0).astype(jnp.float32)

    out_flat = pl.pallas_call(
        submodel_kernel,
        out_shape=jax.ShapeDtypeStruct((digital * B, C), jnp.float32),
        in_specs=[pl.BlockSpec(memory_space=pltpu.MemorySpace.VMEM)] * 7,
        out_specs=pl.BlockSpec(memory_space=pltpu.MemorySpace.VMEM),
        scratch_shapes=[pltpu.VMEM((digital * B, H), jnp.float32)],   # kept h1 states
    )(xproj,
      params["whh0"].astype(jnp.bfloat16),
      params["wih1"].astype(jnp.bfloat16),
      params["whh1"].astype(jnp.bfloat16),
      params["b1"],
      params["wf"].astype(jnp.bfloat16),
      params["bf"])

    out = out_flat.reshape(digital, B, C)        # free layout changes in XLA
    return jnp.transpose(out, (1, 0, 2))         # x.transpose(0, 1) -> (B, digital, C)


def submodel_reference(x, params, digital):
    """Pure-JAX f32 reference mirroring SubModel.forward (for correctness check)."""
    B, L, C = x.shape
    H = params["whh0"].shape[0]
    x_seq = jnp.concatenate([jnp.transpose(x, (1, 0, 2)),
                             jnp.zeros((digital, B, C), x.dtype)], axis=0)

    def cell(x_t, h, c, wih, whh, b):
        g = x_t @ wih + h @ whh + b
        i = jax.nn.sigmoid(g[:, 0:H])
        f = jax.nn.sigmoid(g[:, H:2 * H])
        gg = jnp.tanh(g[:, 2 * H:3 * H])
        o = jax.nn.sigmoid(g[:, 3 * H:4 * H])
        c = f * c + i * gg
        return o * jnp.tanh(c), c

    def scan_step(carry, x_t):
        h0, c0, h1, c1 = carry
        h0, c0 = cell(x_t, h0, c0, params["wih0"], params["whh0"], params["b0"])
        h1, c1 = cell(h0, h1, c1, params["wih1"], params["whh1"], params["b1"])
        return (h0, c0, h1, c1), h1

    z = jnp.zeros((B, H), jnp.float32)
    _, h1s = lax.scan(scan_step, (z, z, z, z), x_seq)
    logits = h1s @ params["wf"] + params["bf"]
    probs = jax.nn.softmax(logits, axis=-1)
    return jnp.transpose(probs[-digital:], (1, 0, 2))


def init_params(key, class_num, hidden_size):
    """Deterministic init mirroring PyTorch default U(-1/sqrt(H), 1/sqrt(H))."""
    H, C = hidden_size, class_num
    k = 1.0 / jnp.sqrt(jnp.float32(H))
    keys = jax.random.split(key, 12)

    def u(kk, shape):
        return jax.random.uniform(kk, shape, jnp.float32, minval=-k, maxval=k)

    return {
        # layer 0: input_size = C
        "wih0": u(keys[0], (C, 4 * H)),        # W_ih^T
        "whh0": u(keys[1], (H, 4 * H)),        # W_hh^T
        "b0":   u(keys[2], (1, 4 * H)) + u(keys[3], (1, 4 * H)),   # b_ih + b_hh
        # layer 1: input_size = H
        "wih1": u(keys[4], (H, 4 * H)),
        "whh1": u(keys[5], (H, 4 * H)),
        "b1":   u(keys[6], (1, 4 * H)) + u(keys[7], (1, 4 * H)),
        # fc1: Linear(H, C)
        "wf":   u(keys[8], (H, C)),            # W^T
        "bf":   u(keys[9], (1, C)),
    }


if __name__ == "__main__":
    # Small, consistent shapes: digital=3 -> expressions like "123-045" have length 7.
    digital = 3
    batch = 8            # stands in for args.batch_size
    class_num = 12       # character vocabulary (digits 0-9, '-', pad)
    hidden_size = 32
    seq_len = 2 * digital + 1

    key = jax.random.PRNGKey(0)
    k_param, k_data = jax.random.split(key)

    params = init_params(k_param, class_num, hidden_size)

    # one-hot encoded input expressions: (B, L, C)
    char_ids = jax.random.randint(k_data, (batch, seq_len), 0, class_num)
    x = jax.nn.one_hot(char_ids, class_num, dtype=jnp.float32)

    y = submodel_forward(x, params, digital)
    y = jax.block_until_ready(y)

    assert y.shape == (batch, digital, class_num), y.shape
    # softmax rows should sum to ~1 (approx reciprocal in the kernel -> small slack)
    assert jnp.allclose(jnp.sum(y, axis=-1), 1.0, atol=3e-3)
    # matches the pure-JAX f32 reference of SubModel.forward (bf16 MXU path in kernel)
    y_ref = submodel_reference(x, params, digital)
    assert jnp.allclose(y, y_ref, atol=1e-2), float(jnp.max(jnp.abs(y - y_ref)))

    print("KERNEL_OK")
</pallas_src>

<mosaic_0001>
module attributes {stable_mosaic.version = 11 : i64} {
  func.func @submodel_kernel(%arg0: memref<10x8x128xf32, #tpu.memory_space<vmem>>, %arg1: memref<32x128xbf16, #tpu.memory_space<vmem>>, %arg2: memref<32x128xbf16, #tpu.memory_space<vmem>>, %arg3: memref<32x128xbf16, #tpu.memory_space<vmem>>, %arg4: memref<1x128xf32, #tpu.memory_space<vmem>>, %arg5: memref<32x12xbf16, #tpu.memory_space<vmem>>, %arg6: memref<1x12xf32, #tpu.memory_space<vmem>>, %arg7: memref<24x12xf32, #tpu.memory_space<vmem>>, %arg8: memref<24x32xf32, #tpu.memory_space<vmem>>) attributes {dimension_semantics = [], scalar_prefetch = 0 : i64, scratch_operands = 1 : i64, tpu.core_type = #tpu.core_type<tc>} {
    %c0 = arith.constant 0 : index
    %c0_0 = arith.constant 0 : index
    %0 = vector.load %arg1[%c0, %c0_0] : memref<32x128xbf16, #tpu.memory_space<vmem>>, vector<32x128xbf16>
    %c0_1 = arith.constant 0 : index
    %c0_2 = arith.constant 0 : index
    %1 = vector.load %arg2[%c0_1, %c0_2] : memref<32x128xbf16, #tpu.memory_space<vmem>>, vector<32x128xbf16>
    %c0_3 = arith.constant 0 : index
    %c0_4 = arith.constant 0 : index
    %2 = vector.load %arg3[%c0_3, %c0_4] : memref<32x128xbf16, #tpu.memory_space<vmem>>, vector<32x128xbf16>
    %c0_5 = arith.constant 0 : index
    %c0_6 = arith.constant 0 : index
    %3 = vector.load %arg4[%c0_5, %c0_6] : memref<1x128xf32, #tpu.memory_space<vmem>>, vector<1x128xf32>
    %4 = vector.shape_cast %3 : vector<1x128xf32> to vector<1x128xf32>
    %5 = vector.broadcast %4 : vector<1x128xf32> to vector<8x128xf32>
    %cst = arith.constant 0.000000e+00 : f32
    %6 = vector.broadcast %cst : f32 to vector<8x32xf32>
    %c0_i32 = arith.constant 0 : i32
    %7 = arith.truncf %6 : vector<8x32xf32> to vector<8x32xbf16>
    %cst_7 = arith.constant dense<0.000000e+00> : vector<8x128xf32>
    %8 = tpu.matmul %7, %2, %cst_7 {dimension_numbers = #tpu.dot_dimension_numbers<[1], [0], [0], [1], [0, 0, 1, 1], [], []>} : vector<8x32xbf16>, vector<32x128xbf16>, vector<8x128xf32> -> vector<8x128xf32>
    %9 = arith.index_cast %c0_i32 : i32 to index
    %c0_8 = arith.constant 0 : index
    %c0_9 = arith.constant 0 : index
    %10 = vector.load %arg0[%9, %c0_8, %c0_9] : memref<10x8x128xf32, #tpu.memory_space<vmem>>, vector<1x8x128xf32>
    %11 = vector.shape_cast %10 : vector<1x8x128xf32> to vector<8x128xf32>
    %12 = arith.truncf %6 : vector<8x32xf32> to vector<8x32xbf16>
    %cst_10 = arith.constant dense<0.000000e+00> : vector<8x128xf32>
    %13 = tpu.matmul %12, %0, %cst_10 {dimension_numbers = #tpu.dot_dimension_numbers<[1], [0], [0], [1], [0, 0, 1, 1], [], []>} : vector<8x32xbf16>, vector<32x128xbf16>, vector<8x128xf32> -> vector<8x128xf32>
    %14 = arith.addf %11, %13 : vector<8x128xf32>
    %15 = arith.negf %14 : vector<8x128xf32>
    %16 = math.exp %15 : vector<8x128xf32>
    %cst_11 = arith.constant 1.000000e+00 : f32
    %17 = vector.broadcast %cst_11 : f32 to vector<8x128xf32>
    %18 = arith.addf %17, %16 : vector<8x128xf32>
    %19 = arith.divf %17, %18 : vector<8x128xf32>
    %20 = math.tanh %14 : vector<8x128xf32>
    %21 = vector.extract_strided_slice %19 {offsets = [0, 32], sizes = [8, 32], strides = [1, 1]} : vector<8x128xf32> to vector<8x32xf32>
    %22 = arith.mulf %21, %6 : vector<8x32xf32>
    %23 = vector.extract_strided_slice %19 {offsets = [0, 0], sizes = [8, 32], strides = [1, 1]} : vector<8x128xf32> to vector<8x32xf32>
    %24 = vector.extract_strided_slice %20 {offsets = [0, 64], sizes = [8, 32], strides = [1, 1]} : vector<8x128xf32> to vector<8x32xf32>
    %25 = arith.mulf %23, %24 : vector<8x32xf32>
    %26 = arith.addf %22, %25 : vector<8x32xf32>
    %27 = vector.extract_strided_slice %19 {offsets = [0, 96], sizes = [8, 32], strides = [1, 1]} : vector<8x128xf32> to vector<8x32xf32>
    %28 = math.tanh %26 : vector<8x32xf32>
    %29 = arith.mulf %27, %28 : vector<8x32xf32>
    %30 = arith.truncf %29 : vector<8x32xf32> to vector<8x32xbf16>
    %cst_12 = arith.constant dense<0.000000e+00> : vector<8x128xf32>
    %31 = tpu.matmul %30, %1, %cst_12 {dimension_numbers = #tpu.dot_dimension_numbers<[1], [0], [0], [1], [0, 0, 1, 1], [], []>} : vector<8x32xbf16>, vector<32x128xbf16>, vector<8x128xf32> -> vector<8x128xf32>
    %32 = arith.addf %31, %8 : vector<8x128xf32>
    %33 = arith.addf %32, %5 : vector<8x128xf32>
    %34 = arith.negf %33 : vector<8x128xf32>
    %35 = math.exp %34 : vector<8x128xf32>
    %cst_13 = arith.constant 1.000000e+00 : f32
    %36 = vector.broadcast %cst_13 : f32 to vector<8x128xf32>
    %37 = arith.addf %36, %35 : vector<8x128xf32>
    %38 = arith.divf %36, %37 : vector<8x128xf32>
    %39 = math.tanh %33 : vector<8x128xf32>
    %40 = vector.extract_strided_slice %38 {offsets = [0, 32], sizes = [8, 32], strides = [1, 1]} : vector<8x128xf32> to vector<8x32xf32>
    %41 = arith.mulf %40, %6 : vector<8x32xf32>
    %42 = vector.extract_strided_slice %38 {offsets = [0, 0], sizes = [8, 32], strides = [1, 1]} : vector<8x128xf32> to vector<8x32xf32>
    %43 = vector.extract_strided_slice %39 {offsets = [0, 64], sizes = [8, 32], strides = [1, 1]} : vector<8x128xf32> to vector<8x32xf32>
    %44 = arith.mulf %42, %43 : vector<8x32xf32>
    %45 = arith.addf %41, %44 : vector<8x32xf32>
    %46 = vector.extract_strided_slice %38 {offsets = [0, 96], sizes = [8, 32], strides = [1, 1]} : vector<8x128xf32> to vector<8x32xf32>
    %47 = math.tanh %45 : vector<8x32xf32>
    %48 = arith.mulf %46, %47 : vector<8x32xf32>
    %c7_i32 = arith.constant 7 : i32
    %49 = arith.cmpi sge, %c0_i32, %c7_i32 : i32
    %50 = arith.extui %49 : i1 to i32
    %c0_i32_14 = arith.constant 0 : i32
    %51 = arith.cmpi ne, %50, %c0_i32_14 : i32
    scf.if %51 {
      %c7_i32_108 = arith.constant 7 : i32
      %475 = arith.subi %c0_i32, %c7_i32_108 : i32
      %c8_i32_109 = arith.constant 8 : i32
      %476 = arith.muli %475, %c8_i32_109 : i32
      %477 = tpu.assume_multiple %476, 8 : i32
      %478 = arith.index_cast %477 : i32 to index
      %c0_110 = arith.constant 0 : index
      %479 = vector.load %arg8[%478, %c0_110] : memref<24x32xf32, #tpu.memory_space<vmem>>, vector<8x32xf32>
      tpu.vector_store %arg8[%478, %c0_110], %48 {strides = array<i32>} : memref<24x32xf32, #tpu.memory_space<vmem>>, vector<8x32xf32>,
    } else {
    }
    %c1_i32 = arith.constant 1 : i32
    %52 = arith.truncf %48 : vector<8x32xf32> to vector<8x32xbf16>
    %cst_15 = arith.constant dense<0.000000e+00> : vector<8x128xf32>
    %53 = tpu.matmul %52, %2, %cst_15 {dimension_numbers = #tpu.dot_dimension_numbers<[1], [0], [0], [1], [0, 0, 1, 1], [], []>} : vector<8x32xbf16>, vector<32x128xbf16>, vector<8x128xf32> -> vector<8x128xf32>
    %54 = arith.index_cast %c1_i32 : i32 to index
    %c0_16 = arith.constant 0 : index
    %c0_17 = arith.constant 0 : index
    %55 = vector.load %arg0[%54, %c0_16, %c0_17] : memref<10x8x128xf32, #tpu.memory_space<vmem>>, vector<1x8x128xf32>
    %56 = vector.shape_cast %55 : vector<1x8x128xf32> to vector<8x128xf32>
    %57 = arith.truncf %29 : vector<8x32xf32> to vector<8x32xbf16>
    %cst_18 = arith.constant dense<0.000000e+00> : vector<8x128xf32>
    %58 = tpu.matmul %57, %0, %cst_18 {dimension_numbers = #tpu.dot_dimension_numbers<[1], [0], [0], [1], [0, 0, 1, 1], [], []>} : vector<8x32xbf16>, vector<32x128xbf16>, vector<8x128xf32> -> vector<8x128xf32>
    %59 = arith.addf %56, %58 : vector<8x128xf32>
    %60 = arith.negf %59 : vector<8x128xf32>
    %61 = math.exp %60 : vector<8x128xf32>
    %cst_19 = arith.constant 1.000000e+00 : f32
    %62 = vector.broadcast %cst_19 : f32 to vector<8x128xf32>
    %63 = arith.addf %62, %61 : vector<8x128xf32>
    %64 = arith.divf %62, %63 : vector<8x128xf32>
    %65 = math.tanh %59 : vector<8x128xf32>
    %66 = vector.extract_strided_slice %64 {offsets = [0, 32], sizes = [8, 32], strides = [1, 1]} : vector<8x128xf32> to vector<8x32xf32>
    %67 = arith.mulf %66, %26 : vector<8x32xf32>
    %68 = vector.extract_strided_slice %64 {offsets = [0, 0], sizes = [8, 32], strides = [1, 1]} : vector<8x128xf32> to vector<8x32xf32>
    %69 = vector.extract_strided_slice %65 {offsets = [0, 64], sizes = [8, 32], strides = [1, 1]} : vector<8x128xf32> to vector<8x32xf32>
    %70 = arith.mulf %68, %69 : vector<8x32xf32>
    %71 = arith.addf %67, %70 : vector<8x32xf32>
    %72 = vector.extract_strided_slice %64 {offsets = [0, 96], sizes = [8, 32], strides = [1, 1]} : vector<8x128xf32> to vector<8x32xf32>
    %73 = math.tanh %71 : vector<8x32xf32>
    %74 = arith.mulf %72, %73 : vector<8x32xf32>
    %75 = arith.truncf %74 : vector<8x32xf32> to vector<8x32xbf16>
    %cst_20 = arith.constant dense<0.000000e+00> : vector<8x128xf32>
    %76 = tpu.matmul %75, %1, %cst_20 {dimension_numbers = #tpu.dot_dimension_numbers<[1], [0], [0], [1], [0, 0, 1, 1], [], []>} : vector<8x32xbf16>, vector<32x128xbf16>, vector<8x128xf32> -> vector<8x128xf32>
    %77 = arith.addf %76, %53 : vector<8x128xf32>
    %78 = arith.addf %77, %5 : vector<8x128xf32>
    %79 = arith.negf %78 : vector<8x128xf32>
    %80 = math.exp %79 : vector<8x128xf32>
    %cst_21 = arith.constant 1.000000e+00 : f32
    %81 = vector.broadcast %cst_21 : f32 to vector<8x128xf32>
    %82 = arith.addf %81, %80 : vector<8x128xf32>
    %83 = arith.divf %81, %82 : vector<8x128xf32>
    %84 = math.tanh %78 : vector<8x128xf32>
    %85 = vector.extract_strided_slice %83 {offsets = [0, 32], sizes = [8, 32], strides = [1, 1]} : vector<8x128xf32> to vector<8x32xf32>
    %86 = arith.mulf %85, %45 : vector<8x32xf32>
    %87 = vector.extract_strided_slice %83 {offsets = [0, 0], sizes = [8, 32], strides = [1, 1]} : vector<8x128xf32> to vector<8x32xf32>
    %88 = vector.extract_strided_slice %84 {offsets = [0, 64], sizes = [8, 32], strides = [1, 1]} : vector<8x128xf32> to vector<8x32xf32>
    %89 = arith.mulf %87, %88 : vector<8x32xf32>
    %90 = arith.addf %86, %89 : vector<8x32xf32>
    %91 = vector.extract_strided_slice %83 {offsets = [0, 96], sizes = [8, 32], strides = [1, 1]} : vector<8x128xf32> to vector<8x32xf32>
    %92 = math.tanh %90 : vector<8x32xf32>
    %93 = arith.mulf %91, %92 : vector<8x32xf32>
    %c7_i32_22 = arith.constant 7 : i32
    %94 = arith.cmpi sge, %c1_i32, %c7_i32_22 : i32
    %95 = arith.extui %94 : i1 to i32
    %c0_i32_23 = arith.constant 0 : i32
    %96 = arith.cmpi ne, %95, %c0_i32_23 : i32
    scf.if %96 {
      %c7_i32_108 = arith.constant 7 : i32
      %475 = arith.subi %c1_i32, %c7_i32_108 : i32
      %c8_i32_109 = arith.constant 8 : i32
      %476 = arith.muli %475, %c8_i32_109 : i32
      %477 = tpu.assume_multiple %476, 8 : i32
      %478 = arith.index_cast %477 : i32 to index
      %c0_110 = arith.constant 0 : index
      %479 = vector.load %arg8[%478, %c0_110] : memref<24x32xf32, #tpu.memory_space<vmem>>, vector<8x32xf32>
      tpu.vector_store %arg8[%478, %c0_110], %93 {strides = array<i32>} : memref<24x32xf32, #tpu.memory_space<vmem>>, vector<8x32xf32>,
    } else {
    }
    %c2_i32 = arith.constant 2 : i32
    %97 = arith.truncf %93 : vector<8x32xf32> to vector<8x32xbf16>
    %cst_24 = arith.constant dense<0.000000e+00> : vector<8x128xf32>
    %98 = tpu.matmul %97, %2, %cst_24 {dimension_numbers = #tpu.dot_dimension_numbers<[1], [0], [0], [1], [0, 0, 1, 1], [], []>} : vector<8x32xbf16>, vector<32x128xbf16>, vector<8x128xf32> -> vector<8x128xf32>
    %99 = arith.index_cast %c2_i32 : i32 to index
    %c0_25 = arith.constant 0 : index
    %c0_26 = arith.constant 0 : index
    %100 = vector.load %arg0[%99, %c0_25, %c0_26] : memref<10x8x128xf32, #tpu.memory_space<vmem>>, vector<1x8x128xf32>
    %101 = vector.shape_cast %100 : vector<1x8x128xf32> to vector<8x128xf32>
    %102 = arith.truncf %74 : vector<8x32xf32> to vector<8x32xbf16>
    %cst_27 = arith.constant dense<0.000000e+00> : vector<8x128xf32>
    %103 = tpu.matmul %102, %0, %cst_27 {dimension_numbers = #tpu.dot_dimension_numbers<[1], [0], [0], [1], [0, 0, 1, 1], [], []>} : vector<8x32xbf16>, vector<32x128xbf16>, vector<8x128xf32> -> vector<8x128xf32>
    %104 = arith.addf %101, %103 : vector<8x128xf32>
    %105 = arith.negf %104 : vector<8x128xf32>
    %106 = math.exp %105 : vector<8x128xf32>
    %cst_28 = arith.constant 1.000000e+00 : f32
    %107 = vector.broadcast %cst_28 : f32 to vector<8x128xf32>
    %108 = arith.addf %107, %106 : vector<8x128xf32>
    %109 = arith.divf %107, %108 : vector<8x128xf32>
    %110 = math.tanh %104 : vector<8x128xf32>
    %111 = vector.extract_strided_slice %109 {offsets = [0, 32], sizes = [8, 32], strides = [1, 1]} : vector<8x128xf32> to vector<8x32xf32>
    %112 = arith.mulf %111, %71 : vector<8x32xf32>
    %113 = vector.extract_strided_slice %109 {offsets = [0, 0], sizes = [8, 32], strides = [1, 1]} : vector<8x128xf32> to vector<8x32xf32>
    %114 = vector.extract_strided_slice %110 {offsets = [0, 64], sizes = [8, 32], strides = [1, 1]} : vector<8x128xf32> to vector<8x32xf32>
    %115 = arith.mulf %113, %114 : vector<8x32xf32>
    %116 = arith.addf %112, %115 : vector<8x32xf32>
    %117 = vector.extract_strided_slice %109 {offsets = [0, 96], sizes = [8, 32], strides = [1, 1]} : vector<8x128xf32> to vector<8x32xf32>
    %118 = math.tanh %116 : vector<8x32xf32>
    %119 = arith.mulf %117, %118 : vector<8x32xf32>
    %120 = arith.truncf %119 : vector<8x32xf32> to vector<8x32xbf16>
    %cst_29 = arith.constant dense<0.000000e+00> : vector<8x128xf32>
    %121 = tpu.matmul %120, %1, %cst_29 {dimension_numbers = #tpu.dot_dimension_numbers<[1], [0], [0], [1], [0, 0, 1, 1], [], []>} : vector<8x32xbf16>, vector<32x128xbf16>, vector<8x128xf32> -> vector<8x128xf32>
    %122 = arith.addf %121, %98 : vector<8x128xf32>
    %123 = arith.addf %122, %5 : vector<8x128xf32>
    %124 = arith.negf %123 : vector<8x128xf32>
    %125 = math.exp %124 : vector<8x128xf32>
    %cst_30 = arith.constant 1.000000e+00 : f32
    %126 = vector.broadcast %cst_30 : f32 to vector<8x128xf32>
    %127 = arith.addf %126, %125 : vector<8x128xf32>
    %128 = arith.divf %126, %127 : vector<8x128xf32>
    %129 = math.tanh %123 : vector<8x128xf32>
    %130 = vector.extract_strided_slice %128 {offsets = [0, 32], sizes = [8, 32], strides = [1, 1]} : vector<8x128xf32> to vector<8x32xf32>
    %131 = arith.mulf %130, %90 : vector<8x32xf32>
    %132 = vector.extract_strided_slice %128 {offsets = [0, 0], sizes = [8, 32], strides = [1, 1]} : vector<8x128xf32> to vector<8x32xf32>
    %133 = vector.extract_strided_slice %129 {offsets = [0, 64], sizes = [8, 32], strides = [1, 1]} : vector<8x128xf32> to vector<8x32xf32>
    %134 = arith.mulf %132, %133 : vector<8x32xf32>
    %135 = arith.addf %131, %134 : vector<8x32xf32>
    %136 = vector.extract_strided_slice %128 {offsets = [0, 96], sizes = [8, 32], strides = [1, 1]} : vector<8x128xf32> to vector<8x32xf32>
    %137 = math.tanh %135 : vector<8x32xf32>
    %138 = arith.mulf %136, %137 : vector<8x32xf32>
    %c7_i32_31 = arith.constant 7 : i32
    %139 = arith.cmpi sge, %c2_i32, %c7_i32_31 : i32
    %140 = arith.extui %139 : i1 to i32
    %c0_i32_32 = arith.constant 0 : i32
    %141 = arith.cmpi ne, %140, %c0_i32_32 : i32
    scf.if %141 {
      %c7_i32_108 = arith.constant 7 : i32
      %475 = arith.subi %c2_i32, %c7_i32_108 : i32
      %c8_i32_109 = arith.constant 8 : i32
      %476 = arith.muli %475, %c8_i32_109 : i32
      %477 = tpu.assume_multiple %476, 8 : i32
      %478 = arith.index_cast %477 : i32 to index
      %c0_110 = arith.constant 0 : index
      %479 = vector.load %arg8[%478, %c0_110] : memref<24x32xf32, #tpu.memory_space<vmem>>, vector<8x32xf32>
      tpu.vector_store %arg8[%478, %c0_110], %138 {strides = array<i32>} : memref<24x32xf32, #tpu.memory_space<vmem>>, vector<8x32xf32>,
    } else {
    }
    %c3_i32 = arith.constant 3 : i32
    %142 = arith.truncf %138 : vector<8x32xf32> to vector<8x32xbf16>
    %cst_33 = arith.constant dense<0.000000e+00> : vector<8x128xf32>
    %143 = tpu.matmul %142, %2, %cst_33 {dimension_numbers = #tpu.dot_dimension_numbers<[1], [0], [0], [1], [0, 0, 1, 1], [], []>} : vector<8x32xbf16>, vector<32x128xbf16>, vector<8x128xf32> -> vector<8x128xf32>
    %144 = arith.index_cast %c3_i32 : i32 to index
    %c0_34 = arith.constant 0 : index
    %c0_35 = arith.constant 0 : index
    %145 = vector.load %arg0[%144, %c0_34, %c0_35] : memref<10x8x128xf32, #tpu.memory_space<vmem>>, vector<1x8x128xf32>
    %146 = vector.shape_cast %145 : vector<1x8x128xf32> to vector<8x128xf32>
    %147 = arith.truncf %119 : vector<8x32xf32> to vector<8x32xbf16>
    %cst_36 = arith.constant dense<0.000000e+00> : vector<8x128xf32>
    %148 = tpu.matmul %147, %0, %cst_36 {dimension_numbers = #tpu.dot_dimension_numbers<[1], [0], [0], [1], [0, 0, 1, 1], [], []>} : vector<8x32xbf16>, vector<32x128xbf16>, vector<8x128xf32> -> vector<8x128xf32>
    %149 = arith.addf %146, %148 : vector<8x128xf32>
    %150 = arith.negf %149 : vector<8x128xf32>
    %151 = math.exp %150 : vector<8x128xf32>
    %cst_37 = arith.constant 1.000000e+00 : f32
    %152 = vector.broadcast %cst_37 : f32 to vector<8x128xf32>
    %153 = arith.addf %152, %151 : vector<8x128xf32>
    %154 = arith.divf %152, %153 : vector<8x128xf32>
    %155 = math.tanh %149 : vector<8x128xf32>
    %156 = vector.extract_strided_slice %154 {offsets = [0, 32], sizes = [8, 32], strides = [1, 1]} : vector<8x128xf32> to vector<8x32xf32>
    %157 = arith.mulf %156, %116 : vector<8x32xf32>
    %158 = vector.extract_strided_slice %154 {offsets = [0, 0], sizes = [8, 32], strides = [1, 1]} : vector<8x128xf32> to vector<8x32xf32>
    %159 = vector.extract_strided_slice %155 {offsets = [0, 64], sizes = [8, 32], strides = [1, 1]} : vector<8x128xf32> to vector<8x32xf32>
    %160 = arith.mulf %158, %159 : vector<8x32xf32>
    %161 = arith.addf %157, %160 : vector<8x32xf32>
    %162 = vector.extract_strided_slice %154 {offsets = [0, 96], sizes = [8, 32], strides = [1, 1]} : vector<8x128xf32> to vector<8x32xf32>
    %163 = math.tanh %161 : vector<8x32xf32>
    %164 = arith.mulf %162, %163 : vector<8x32xf32>
    %165 = arith.truncf %164 : vector<8x32xf32> to vector<8x32xbf16>
    %cst_38 = arith.constant dense<0.000000e+00> : vector<8x128xf32>
    %166 = tpu.matmul %165, %1, %cst_38 {dimension_numbers = #tpu.dot_dimension_numbers<[1], [0], [0], [1], [0, 0, 1, 1], [], []>} : vector<8x32xbf16>, vector<32x128xbf16>, vector<8x128xf32> -> vector<8x128xf32>
    %167 = arith.addf %166, %143 : vector<8x128xf32>
    %168 = arith.addf %167, %5 : vector<8x128xf32>
    %169 = arith.negf %168 : vector<8x128xf32>
    %170 = math.exp %169 : vector<8x128xf32>
    %cst_39 = arith.constant 1.000000e+00 : f32
    %171 = vector.broadcast %cst_39 : f32 to vector<8x128xf32>
    %172 = arith.addf %171, %170 : vector<8x128xf32>
    %173 = arith.divf %171, %172 : vector<8x128xf32>
    %174 = math.tanh %168 : vector<8x128xf32>
    %175 = vector.extract_strided_slice %173 {offsets = [0, 32], sizes = [8, 32], strides = [1, 1]} : vector<8x128xf32> to vector<8x32xf32>
    %176 = arith.mulf %175, %135 : vector<8x32xf32>
    %177 = vector.extract_strided_slice %173 {offsets = [0, 0], sizes = [8, 32], strides = [1, 1]} : vector<8x128xf32> to vector<8x32xf32>
    %178 = vector.extract_strided_slice %174 {offsets = [0, 64], sizes = [8, 32], strides = [1, 1]} : vector<8x128xf32> to vector<8x32xf32>
    %179 = arith.mulf %177, %178 : vector<8x32xf32>
    %180 = arith.addf %176, %179 : vector<8x32xf32>
    %181 = vector.extract_strided_slice %173 {offsets = [0, 96], sizes = [8, 32], strides = [1, 1]} : vector<8x128xf32> to vector<8x32xf32>
    %182 = math.tanh %180 : vector<8x32xf32>
    %183 = arith.mulf %181, %182 : vector<8x32xf32>
    %c7_i32_40 = arith.constant 7 : i32
    %184 = arith.cmpi sge, %c3_i32, %c7_i32_40 : i32
    %185 = arith.extui %184 : i1 to i32
    %c0_i32_41 = arith.constant 0 : i32
    %186 = arith.cmpi ne, %185, %c0_i32_41 : i32
    scf.if %186 {
      %c7_i32_108 = arith.constant 7 : i32
      %475 = arith.subi %c3_i32, %c7_i32_108 : i32
      %c8_i32_109 = arith.constant 8 : i32
      %476 = arith.muli %475, %c8_i32_109 : i32
      %477 = tpu.assume_multiple %476, 8 : i32
      %478 = arith.index_cast %477 : i32 to index
      %c0_110 = arith.constant 0 : index
      %479 = vector.load %arg8[%478, %c0_110] : memref<24x32xf32, #tpu.memory_space<vmem>>, vector<8x32xf32>
      tpu.vector_store %arg8[%478, %c0_110], %183 {strides = array<i32>} : memref<24x32xf32, #tpu.memory_space<vmem>>, vector<8x32xf32>,
    } else {
    }
    %c4_i32 = arith.constant 4 : i32
    %187 = arith.truncf %183 : vector<8x32xf32> to vector<8x32xbf16>
    %cst_42 = arith.constant dense<0.000000e+00> : vector<8x128xf32>
    %188 = tpu.matmul %187, %2, %cst_42 {dimension_numbers = #tpu.dot_dimension_numbers<[1], [0], [0], [1], [0, 0, 1, 1], [], []>} : vector<8x32xbf16>, vector<32x128xbf16>, vector<8x128xf32> -> vector<8x128xf32>
    %189 = arith.index_cast %c4_i32 : i32 to index
    %c0_43 = arith.constant 0 : index
    %c0_44 = arith.constant 0 : index
    %190 = vector.load %arg0[%189, %c0_43, %c0_44] : memref<10x8x128xf32, #tpu.memory_space<vmem>>, vector<1x8x128xf32>
    %191 = vector.shape_cast %190 : vector<1x8x128xf32> to vector<8x128xf32>
    %192 = arith.truncf %164 : vector<8x32xf32> to vector<8x32xbf16>
    %cst_45 = arith.constant dense<0.000000e+00> : vector<8x128xf32>
    %193 = tpu.matmul %192, %0, %cst_45 {dimension_numbers = #tpu.dot_dimension_numbers<[1], [0], [0], [1], [0, 0, 1, 1], [], []>} : vector<8x32xbf16>, vector<32x128xbf16>, vector<8x128xf32> -> vector<8x128xf32>
    %194 = arith.addf %191, %193 : vector<8x128xf32>
    %195 = arith.negf %194 : vector<8x128xf32>
    %196 = math.exp %195 : vector<8x128xf32>
    %cst_46 = arith.constant 1.000000e+00 : f32
    %197 = vector.broadcast %cst_46 : f32 to vector<8x128xf32>
    %198 = arith.addf %197, %196 : vector<8x128xf32>
    %199 = arith.divf %197, %198 : vector<8x128xf32>
    %200 = math.tanh %194 : vector<8x128xf32>
    %201 = vector.extract_strided_slice %199 {offsets = [0, 32], sizes = [8, 32], strides = [1, 1]} : vector<8x128xf32> to vector<8x32xf32>
    %202 = arith.mulf %201, %161 : vector<8x32xf32>
    %203 = vector.extract_strided_slice %199 {offsets = [0, 0], sizes = [8, 32], strides = [1, 1]} : vector<8x128xf32> to vector<8x32xf32>
    %204 = vector.extract_strided_slice %200 {offsets = [0, 64], sizes = [8, 32], strides = [1, 1]} : vector<8x128xf32> to vector<8x32xf32>
    %205 = arith.mulf %203, %204 : vector<8x32xf32>
    %206 = arith.addf %202, %205 : vector<8x32xf32>
    %207 = vector.extract_strided_slice %199 {offsets = [0, 96], sizes = [8, 32], strides = [1, 1]} : vector<8x128xf32> to vector<8x32xf32>
    %208 = math.tanh %206 : vector<8x32xf32>
    %209 = arith.mulf %207, %208 : vector<8x32xf32>
    %210 = arith.truncf %209 : vector<8x32xf32> to vector<8x32xbf16>
    %cst_47 = arith.constant dense<0.000000e+00> : vector<8x128xf32>
    %211 = tpu.matmul %210, %1, %cst_47 {dimension_numbers = #tpu.dot_dimension_numbers<[1], [0], [0], [1], [0, 0, 1, 1], [], []>} : vector<8x32xbf16>, vector<32x128xbf16>, vector<8x128xf32> -> vector<8x128xf32>
    %212 = arith.addf %211, %188 : vector<8x128xf32>
    %213 = arith.addf %212, %5 : vector<8x128xf32>
    %214 = arith.negf %213 : vector<8x128xf32>
    %215 = math.exp %214 : vector<8x128xf32>
    %cst_48 = arith.constant 1.000000e+00 : f32
    %216 = vector.broadcast %cst_48 : f32 to vector<8x128xf32>
    %217 = arith.addf %216, %215 : vector<8x128xf32>
    %218 = arith.divf %216, %217 : vector<8x128xf32>
    %219 = math.tanh %213 : vector<8x128xf32>
    %220 = vector.extract_strided_slice %218 {offsets = [0, 32], sizes = [8, 32], strides = [1, 1]} : vector<8x128xf32> to vector<8x32xf32>
    %221 = arith.mulf %220, %180 : vector<8x32xf32>
    %222 = vector.extract_strided_slice %218 {offsets = [0, 0], sizes = [8, 32], strides = [1, 1]} : vector<8x128xf32> to vector<8x32xf32>
    %223 = vector.extract_strided_slice %219 {offsets = [0, 64], sizes = [8, 32], strides = [1, 1]} : vector<8x128xf32> to vector<8x32xf32>
    %224 = arith.mulf %222, %223 : vector<8x32xf32>
    %225 = arith.addf %221, %224 : vector<8x32xf32>
    %226 = vector.extract_strided_slice %218 {offsets = [0, 96], sizes = [8, 32], strides = [1, 1]} : vector<8x128xf32> to vector<8x32xf32>
    %227 = math.tanh %225 : vector<8x32xf32>
    %228 = arith.mulf %226, %227 : vector<8x32xf32>
    %c7_i32_49 = arith.constant 7 : i32
    %229 = arith.cmpi sge, %c4_i32, %c7_i32_49 : i32
    %230 = arith.extui %229 : i1 to i32
    %c0_i32_50 = arith.constant 0 : i32
    %231 = arith.cmpi ne, %230, %c0_i32_50 : i32
    scf.if %231 {
      %c7_i32_108 = arith.constant 7 : i32
      %475 = arith.subi %c4_i32, %c7_i32_108 : i32
      %c8_i32_109 = arith.constant 8 : i32
      %476 = arith.muli %475, %c8_i32_109 : i32
      %477 = tpu.assume_multiple %476, 8 : i32
      %478 = arith.index_cast %477 : i32 to index
      %c0_110 = arith.constant 0 : index
      %479 = vector.load %arg8[%478, %c0_110] : memref<24x32xf32, #tpu.memory_space<vmem>>, vector<8x32xf32>
      tpu.vector_store %arg8[%478, %c0_110], %228 {strides = array<i32>} : memref<24x32xf32, #tpu.memory_space<vmem>>, vector<8x32xf32>,
    } else {
    }
    %c5_i32 = arith.constant 5 : i32
    %232 = arith.truncf %228 : vector<8x32xf32> to vector<8x32xbf16>
    %cst_51 = arith.constant dense<0.000000e+00> : vector<8x128xf32>
    %233 = tpu.matmul %232, %2, %cst_51 {dimension_numbers = #tpu.dot_dimension_numbers<[1], [0], [0], [1], [0, 0, 1, 1], [], []>} : vector<8x32xbf16>, vector<32x128xbf16>, vector<8x128xf32> -> vector<8x128xf32>
    %234 = arith.index_cast %c5_i32 : i32 to index
    %c0_52 = arith.constant 0 : index
    %c0_53 = arith.constant 0 : index
    %235 = vector.load %arg0[%234, %c0_52, %c0_53] : memref<10x8x128xf32, #tpu.memory_space<vmem>>, vector<1x8x128xf32>
    %236 = vector.shape_cast %235 : vector<1x8x128xf32> to vector<8x128xf32>
    %237 = arith.truncf %209 : vector<8x32xf32> to vector<8x32xbf16>
    %cst_54 = arith.constant dense<0.000000e+00> : vector<8x128xf32>
    %238 = tpu.matmul %237, %0, %cst_54 {dimension_numbers = #tpu.dot_dimension_numbers<[1], [0], [0], [1], [0, 0, 1, 1], [], []>} : vector<8x32xbf16>, vector<32x128xbf16>, vector<8x128xf32> -> vector<8x128xf32>
    %239 = arith.addf %236, %238 : vector<8x128xf32>
    %240 = arith.negf %239 : vector<8x128xf32>
    %241 = math.exp %240 : vector<8x128xf32>
    %cst_55 = arith.constant 1.000000e+00 : f32
    %242 = vector.broadcast %cst_55 : f32 to vector<8x128xf32>
    %243 = arith.addf %242, %241 : vector<8x128xf32>
    %244 = arith.divf %242, %243 : vector<8x128xf32>
    %245 = math.tanh %239 : vector<8x128xf32>
    %246 = vector.extract_strided_slice %244 {offsets = [0, 32], sizes = [8, 32], strides = [1, 1]} : vector<8x128xf32> to vector<8x32xf32>
    %247 = arith.mulf %246, %206 : vector<8x32xf32>
    %248 = vector.extract_strided_slice %244 {offsets = [0, 0], sizes = [8, 32], strides = [1, 1]} : vector<8x128xf32> to vector<8x32xf32>
    %249 = vector.extract_strided_slice %245 {offsets = [0, 64], sizes = [8, 32], strides = [1, 1]} : vector<8x128xf32> to vector<8x32xf32>
    %250 = arith.mulf %248, %249 : vector<8x32xf32>
    %251 = arith.addf %247, %250 : vector<8x32xf32>
    %252 = vector.extract_strided_slice %244 {offsets = [0, 96], sizes = [8, 32], strides = [1, 1]} : vector<8x128xf32> to vector<8x32xf32>
    %253 = math.tanh %251 : vector<8x32xf32>
    %254 = arith.mulf %252, %253 : vector<8x32xf32>
    %255 = arith.truncf %254 : vector<8x32xf32> to vector<8x32xbf16>
    %cst_56 = arith.constant dense<0.000000e+00> : vector<8x128xf32>
    %256 = tpu.matmul %255, %1, %cst_56 {dimension_numbers = #tpu.dot_dimension_numbers<[1], [0], [0], [1], [0, 0, 1, 1], [], []>} : vector<8x32xbf16>, vector<32x128xbf16>, vector<8x128xf32> -> vector<8x128xf32>
    %257 = arith.addf %256, %233 : vector<8x128xf32>
    %258 = arith.addf %257, %5 : vector<8x128xf32>
    %259 = arith.negf %258 : vector<8x128xf32>
    %260 = math.exp %259 : vector<8x128xf32>
    %cst_57 = arith.constant 1.000000e+00 : f32
    %261 = vector.broadcast %cst_57 : f32 to vector<8x128xf32>
    %262 = arith.addf %261, %260 : vector<8x128xf32>
    %263 = arith.divf %261, %262 : vector<8x128xf32>
    %264 = math.tanh %258 : vector<8x128xf32>
    %265 = vector.extract_strided_slice %263 {offsets = [0, 32], sizes = [8, 32], strides = [1, 1]} : vector<8x128xf32> to vector<8x32xf32>
    %266 = arith.mulf %265, %225 : vector<8x32xf32>
    %267 = vector.extract_strided_slice %263 {offsets = [0, 0], sizes = [8, 32], strides = [1, 1]} : vector<8x128xf32> to vector<8x32xf32>
    %268 = vector.extract_strided_slice %264 {offsets = [0, 64], sizes = [8, 32], strides = [1, 1]} : vector<8x128xf32> to vector<8x32xf32>
    %269 = arith.mulf %267, %268 : vector<8x32xf32>
    %270 = arith.addf %266, %269 : vector<8x32xf32>
    %271 = vector.extract_strided_slice %263 {offsets = [0, 96], sizes = [8, 32], strides = [1, 1]} : vector<8x128xf32> to vector<8x32xf32>
    %272 = math.tanh %270 : vector<8x32xf32>
    %273 = arith.mulf %271, %272 : vector<8x32xf32>
    %c7_i32_58 = arith.constant 7 : i32
    %274 = arith.cmpi sge, %c5_i32, %c7_i32_58 : i32
    %275 = arith.extui %274 : i1 to i32
    %c0_i32_59 = arith.constant 0 : i32
    %276 = arith.cmpi ne, %275, %c0_i32_59 : i32
    scf.if %276 {
      %c7_i32_108 = arith.constant 7 : i32
      %475 = arith.subi %c5_i32, %c7_i32_108 : i32
      %c8_i32_109 = arith.constant 8 : i32
      %476 = arith.muli %475, %c8_i32_109 : i32
      %477 = tpu.assume_multiple %476, 8 : i32
      %478 = arith.index_cast %477 : i32 to index
      %c0_110 = arith.constant 0 : index
      %479 = vector.load %arg8[%478, %c0_110] : memref<24x32xf32, #tpu.memory_space<vmem>>, vector<8x32xf32>
      tpu.vector_store %arg8[%478, %c0_110], %273 {strides = array<i32>} : memref<24x32xf32, #tpu.memory_space<vmem>>, vector<8x32xf32>,
    } else {
    }
    %c6_i32 = arith.constant 6 : i32
    %277 = arith.truncf %273 : vector<8x32xf32> to vector<8x32xbf16>
    %cst_60 = arith.constant dense<0.000000e+00> : vector<8x128xf32>
    %278 = tpu.matmul %277, %2, %cst_60 {dimension_numbers = #tpu.dot_dimension_numbers<[1], [0], [0], [1], [0, 0, 1, 1], [], []>} : vector<8x32xbf16>, vector<32x128xbf16>, vector<8x128xf32> -> vector<8x128xf32>
    %279 = arith.index_cast %c6_i32 : i32 to index
    %c0_61 = arith.constant 0 : index
    %c0_62 = arith.constant 0 : index
    %280 = vector.load %arg0[%279, %c0_61, %c0_62] : memref<10x8x128xf32, #tpu.memory_space<vmem>>, vector<1x8x128xf32>
    %281 = vector.shape_cast %280 : vector<1x8x128xf32> to vector<8x128xf32>
    %282 = arith.truncf %254 : vector<8x32xf32> to vector<8x32xbf16>
    %cst_63 = arith.constant dense<0.000000e+00> : vector<8x128xf32>
    %283 = tpu.matmul %282, %0, %cst_63 {dimension_numbers = #tpu.dot_dimension_numbers<[1], [0], [0], [1], [0, 0, 1, 1], [], []>} : vector<8x32xbf16>, vector<32x128xbf16>, vector<8x128xf32> -> vector<8x128xf32>
    %284 = arith.addf %281, %283 : vector<8x128xf32>
    %285 = arith.negf %284 : vector<8x128xf32>
    %286 = math.exp %285 : vector<8x128xf32>
    %cst_64 = arith.constant 1.000000e+00 : f32
    %287 = vector.broadcast %cst_64 : f32 to vector<8x128xf32>
    %288 = arith.addf %287, %286 : vector<8x128xf32>
    %289 = arith.divf %287, %288 : vector<8x128xf32>
    %290 = math.tanh %284 : vector<8x128xf32>
    %291 = vector.extract_strided_slice %289 {offsets = [0, 32], sizes = [8, 32], strides = [1, 1]} : vector<8x128xf32> to vector<8x32xf32>
    %292 = arith.mulf %291, %251 : vector<8x32xf32>
    %293 = vector.extract_strided_slice %289 {offsets = [0, 0], sizes = [8, 32], strides = [1, 1]} : vector<8x128xf32> to vector<8x32xf32>
    %294 = vector.extract_strided_slice %290 {offsets = [0, 64], sizes = [8, 32], strides = [1, 1]} : vector<8x128xf32> to vector<8x32xf32>
    %295 = arith.mulf %293, %294 : vector<8x32xf32>
    %296 = arith.addf %292, %295 : vector<8x32xf32>
    %297 = vector.extract_strided_slice %289 {offsets = [0, 96], sizes = [8, 32], strides = [1, 1]} : vector<8x128xf32> to vector<8x32xf32>
    %298 = math.tanh %296 : vector<8x32xf32>
    %299 = arith.mulf %297, %298 : vector<8x32xf32>
    %300 = arith.truncf %299 : vector<8x32xf32> to vector<8x32xbf16>
    %cst_65 = arith.constant dense<0.000000e+00> : vector<8x128xf32>
    %301 = tpu.matmul %300, %1, %cst_65 {dimension_numbers = #tpu.dot_dimension_numbers<[1], [0], [0], [1], [0, 0, 1, 1], [], []>} : vector<8x32xbf16>, vector<32x128xbf16>, vector<8x128xf32> -> vector<8x128xf32>
    %302 = arith.addf %301, %278 : vector<8x128xf32>
    %303 = arith.addf %302, %5 : vector<8x128xf32>
    %304 = arith.negf %303 : vector<8x128xf32>
    %305 = math.exp %304 : vector<8x128xf32>
    %cst_66 = arith.constant 1.000000e+00 : f32
    %306 = vector.broadcast %cst_66 : f32 to vector<8x128xf32>
    %307 = arith.addf %306, %305 : vector<8x128xf32>
    %308 = arith.divf %306, %307 : vector<8x128xf32>
    %309 = math.tanh %303 : vector<8x128xf32>
    %310 = vector.extract_strided_slice %308 {offsets = [0, 32], sizes = [8, 32], strides = [1, 1]} : vector<8x128xf32> to vector<8x32xf32>
    %311 = arith.mulf %310, %270 : vector<8x32xf32>
    %312 = vector.extract_strided_slice %308 {offsets = [0, 0], sizes = [8, 32], strides = [1, 1]} : vector<8x128xf32> to vector<8x32xf32>
    %313 = vector.extract_strided_slice %309 {offsets = [0, 64], sizes = [8, 32], strides = [1, 1]} : vector<8x128xf32> to vector<8x32xf32>
    %314 = arith.mulf %312, %313 : vector<8x32xf32>
    %315 = arith.addf %311, %314 : vector<8x32xf32>
    %316 = vector.extract_strided_slice %308 {offsets = [0, 96], sizes = [8, 32], strides = [1, 1]} : vector<8x128xf32> to vector<8x32xf32>
    %317 = math.tanh %315 : vector<8x32xf32>
    %318 = arith.mulf %316, %317 : vector<8x32xf32>
    %c7_i32_67 = arith.constant 7 : i32
    %319 = arith.cmpi sge, %c6_i32, %c7_i32_67 : i32
    %320 = arith.extui %319 : i1 to i32
    %c0_i32_68 = arith.constant 0 : i32
    %321 = arith.cmpi ne, %320, %c0_i32_68 : i32
    scf.if %321 {
      %c7_i32_108 = arith.constant 7 : i32
      %475 = arith.subi %c6_i32, %c7_i32_108 : i32
      %c8_i32_109 = arith.constant 8 : i32
      %476 = arith.muli %475, %c8_i32_109 : i32
      %477 = tpu.assume_multiple %476, 8 : i32
      %478 = arith.index_cast %477 : i32 to index
      %c0_110 = arith.constant 0 : index
      %479 = vector.load %arg8[%478, %c0_110] : memref<24x32xf32, #tpu.memory_space<vmem>>, vector<8x32xf32>
      tpu.vector_store %arg8[%478, %c0_110], %318 {strides = array<i32>} : memref<24x32xf32, #tpu.memory_space<vmem>>, vector<8x32xf32>,
    } else {
    }
    %c7_i32_69 = arith.constant 7 : i32
    %322 = arith.truncf %318 : vector<8x32xf32> to vector<8x32xbf16>
    %cst_70 = arith.constant dense<0.000000e+00> : vector<8x128xf32>
    %323 = tpu.matmul %322, %2, %cst_70 {dimension_numbers = #tpu.dot_dimension_numbers<[1], [0], [0], [1], [0, 0, 1, 1], [], []>} : vector<8x32xbf16>, vector<32x128xbf16>, vector<8x128xf32> -> vector<8x128xf32>
    %324 = arith.index_cast %c7_i32_69 : i32 to index
    %c0_71 = arith.constant 0 : index
    %c0_72 = arith.constant 0 : index
    %325 = vector.load %arg0[%324, %c0_71, %c0_72] : memref<10x8x128xf32, #tpu.memory_space<vmem>>, vector<1x8x128xf32>
    %326 = vector.shape_cast %325 : vector<1x8x128xf32> to vector<8x128xf32>
    %327 = arith.truncf %299 : vector<8x32xf32> to vector<8x32xbf16>
    %cst_73 = arith.constant dense<0.000000e+00> : vector<8x128xf32>
    %328 = tpu.matmul %327, %0, %cst_73 {dimension_numbers = #tpu.dot_dimension_numbers<[1], [0], [0], [1], [0, 0, 1, 1], [], []>} : vector<8x32xbf16>, vector<32x128xbf16>, vector<8x128xf32> -> vector<8x128xf32>
    %329 = arith.addf %326, %328 : vector<8x128xf32>
    %330 = arith.negf %329 : vector<8x128xf32>
    %331 = math.exp %330 : vector<8x128xf32>
    %cst_74 = arith.constant 1.000000e+00 : f32
    %332 = vector.broadcast %cst_74 : f32 to vector<8x128xf32>
    %333 = arith.addf %332, %331 : vector<8x128xf32>
    %334 = arith.divf %332, %333 : vector<8x128xf32>
    %335 = math.tanh %329 : vector<8x128xf32>
    %336 = vector.extract_strided_slice %334 {offsets = [0, 32], sizes = [8, 32], strides = [1, 1]} : vector<8x128xf32> to vector<8x32xf32>
    %337 = arith.mulf %336, %296 : vector<8x32xf32>
    %338 = vector.extract_strided_slice %334 {offsets = [0, 0], sizes = [8, 32], strides = [1, 1]} : vector<8x128xf32> to vector<8x32xf32>
    %339 = vector.extract_strided_slice %335 {offsets = [0, 64], sizes = [8, 32], strides = [1, 1]} : vector<8x128xf32> to vector<8x32xf32>
    %340 = arith.mulf %338, %339 : vector<8x32xf32>
    %341 = arith.addf %337, %340 : vector<8x32xf32>
    %342 = vector.extract_strided_slice %334 {offsets = [0, 96], sizes = [8, 32], strides = [1, 1]} : vector<8x128xf32> to vector<8x32xf32>
    %343 = math.tanh %341 : vector<8x32xf32>
    %344 = arith.mulf %342, %343 : vector<8x32xf32>
    %345 = arith.truncf %344 : vector<8x32xf32> to vector<8x32xbf16>
    %cst_75 = arith.constant dense<0.000000e+00> : vector<8x128xf32>
    %346 = tpu.matmul %345, %1, %cst_75 {dimension_numbers = #tpu.dot_dimension_numbers<[1], [0], [0], [1], [0, 0, 1, 1], [], []>} : vector<8x32xbf16>, vector<32x128xbf16>, vector<8x128xf32> -> vector<8x128xf32>
    %347 = arith.addf %346, %323 : vector<8x128xf32>
    %348 = arith.addf %347, %5 : vector<8x128xf32>
    %349 = arith.negf %348 : vector<8x128xf32>
    %350 = math.exp %349 : vector<8x128xf32>
    %cst_76 = arith.constant 1.000000e+00 : f32
    %351 = vector.broadcast %cst_76 : f32 to vector<8x128xf32>
    %352 = arith.addf %351, %350 : vector<8x128xf32>
    %353 = arith.divf %351, %352 : vector<8x128xf32>
    %354 = math.tanh %348 : vector<8x128xf32>
    %355 = vector.extract_strided_slice %353 {offsets = [0, 32], sizes = [8, 32], strides = [1, 1]} : vector<8x128xf32> to vector<8x32xf32>
    %356 = arith.mulf %355, %315 : vector<8x32xf32>
    %357 = vector.extract_strided_slice %353 {offsets = [0, 0], sizes = [8, 32], strides = [1, 1]} : vector<8x128xf32> to vector<8x32xf32>
    %358 = vector.extract_strided_slice %354 {offsets = [0, 64], sizes = [8, 32], strides = [1, 1]} : vector<8x128xf32> to vector<8x32xf32>
    %359 = arith.mulf %357, %358 : vector<8x32xf32>
    %360 = arith.addf %356, %359 : vector<8x32xf32>
    %361 = vector.extract_strided_slice %353 {offsets = [0, 96], sizes = [8, 32], strides = [1, 1]} : vector<8x128xf32> to vector<8x32xf32>
    %362 = math.tanh %360 : vector<8x32xf32>
    %363 = arith.mulf %361, %362 : vector<8x32xf32>
    %c7_i32_77 = arith.constant 7 : i32
    %364 = arith.cmpi sge, %c7_i32_69, %c7_i32_77 : i32
    %365 = arith.extui %364 : i1 to i32
    %c0_i32_78 = arith.constant 0 : i32
    %366 = arith.cmpi ne, %365, %c0_i32_78 : i32
    scf.if %366 {
      %c7_i32_108 = arith.constant 7 : i32
      %475 = arith.subi %c7_i32_69, %c7_i32_108 : i32
      %c8_i32_109 = arith.constant 8 : i32
      %476 = arith.muli %475, %c8_i32_109 : i32
      %477 = tpu.assume_multiple %476, 8 : i32
      %478 = arith.index_cast %477 : i32 to index
      %c0_110 = arith.constant 0 : index
      %479 = vector.load %arg8[%478, %c0_110] : memref<24x32xf32, #tpu.memory_space<vmem>>, vector<8x32xf32>
      tpu.vector_store %arg8[%478, %c0_110], %363 {strides = array<i32>} : memref<24x32xf32, #tpu.memory_space<vmem>>, vector<8x32xf32>,
    } else {
    }
    %c8_i32 = arith.constant 8 : i32
    %367 = arith.truncf %363 : vector<8x32xf32> to vector<8x32xbf16>
    %cst_79 = arith.constant dense<0.000000e+00> : vector<8x128xf32>
    %368 = tpu.matmul %367, %2, %cst_79 {dimension_numbers = #tpu.dot_dimension_numbers<[1], [0], [0], [1], [0, 0, 1, 1], [], []>} : vector<8x32xbf16>, vector<32x128xbf16>, vector<8x128xf32> -> vector<8x128xf32>
    %369 = arith.index_cast %c8_i32 : i32 to index
    %c0_80 = arith.constant 0 : index
    %c0_81 = arith.constant 0 : index
    %370 = vector.load %arg0[%369, %c0_80, %c0_81] : memref<10x8x128xf32, #tpu.memory_space<vmem>>, vector<1x8x128xf32>
    %371 = vector.shape_cast %370 : vector<1x8x128xf32> to vector<8x128xf32>
    %372 = arith.truncf %344 : vector<8x32xf32> to vector<8x32xbf16>
    %cst_82 = arith.constant dense<0.000000e+00> : vector<8x128xf32>
    %373 = tpu.matmul %372, %0, %cst_82 {dimension_numbers = #tpu.dot_dimension_numbers<[1], [0], [0], [1], [0, 0, 1, 1], [], []>} : vector<8x32xbf16>, vector<32x128xbf16>, vector<8x128xf32> -> vector<8x128xf32>
    %374 = arith.addf %371, %373 : vector<8x128xf32>
    %375 = arith.negf %374 : vector<8x128xf32>
    %376 = math.exp %375 : vector<8x128xf32>
    %cst_83 = arith.constant 1.000000e+00 : f32
    %377 = vector.broadcast %cst_83 : f32 to vector<8x128xf32>
    %378 = arith.addf %377, %376 : vector<8x128xf32>
    %379 = arith.divf %377, %378 : vector<8x128xf32>
    %380 = math.tanh %374 : vector<8x128xf32>
    %381 = vector.extract_strided_slice %379 {offsets = [0, 32], sizes = [8, 32], strides = [1, 1]} : vector<8x128xf32> to vector<8x32xf32>
    %382 = arith.mulf %381, %341 : vector<8x32xf32>
    %383 = vector.extract_strided_slice %379 {offsets = [0, 0], sizes = [8, 32], strides = [1, 1]} : vector<8x128xf32> to vector<8x32xf32>
    %384 = vector.extract_strided_slice %380 {offsets = [0, 64], sizes = [8, 32], strides = [1, 1]} : vector<8x128xf32> to vector<8x32xf32>
    %385 = arith.mulf %383, %384 : vector<8x32xf32>
    %386 = arith.addf %382, %385 : vector<8x32xf32>
    %387 = vector.extract_strided_slice %379 {offsets = [0, 96], sizes = [8, 32], strides = [1, 1]} : vector<8x128xf32> to vector<8x32xf32>
    %388 = math.tanh %386 : vector<8x32xf32>
    %389 = arith.mulf %387, %388 : vector<8x32xf32>
    %390 = arith.truncf %389 : vector<8x32xf32> to vector<8x32xbf16>
    %cst_84 = arith.constant dense<0.000000e+00> : vector<8x128xf32>
    %391 = tpu.matmul %390, %1, %cst_84 {dimension_numbers = #tpu.dot_dimension_numbers<[1], [0], [0], [1], [0, 0, 1, 1], [], []>} : vector<8x32xbf16>, vector<32x128xbf16>, vector<8x128xf32> -> vector<8x128xf32>
    %392 = arith.addf %391, %368 : vector<8x128xf32>
    %393 = arith.addf %392, %5 : vector<8x128xf32>
    %394 = arith.negf %393 : vector<8x128xf32>
    %395 = math.exp %394 : vector<8x128xf32>
    %cst_85 = arith.constant 1.000000e+00 : f32
    %396 = vector.broadcast %cst_85 : f32 to vector<8x128xf32>
    %397 = arith.addf %396, %395 : vector<8x128xf32>
    %398 = arith.divf %396, %397 : vector<8x128xf32>
    %399 = math.tanh %393 : vector<8x128xf32>
    %400 = vector.extract_strided_slice %398 {offsets = [0, 32], sizes = [8, 32], strides = [1, 1]} : vector<8x128xf32> to vector<8x32xf32>
    %401 = arith.mulf %400, %360 : vector<8x32xf32>
    %402 = vector.extract_strided_slice %398 {offsets = [0, 0], sizes = [8, 32], strides = [1, 1]} : vector<8x128xf32> to vector<8x32xf32>
    %403 = vector.extract_strided_slice %399 {offsets = [0, 64], sizes = [8, 32], strides = [1, 1]} : vector<8x128xf32> to vector<8x32xf32>
    %404 = arith.mulf %402, %403 : vector<8x32xf32>
    %405 = arith.addf %401, %404 : vector<8x32xf32>
    %406 = vector.extract_strided_slice %398 {offsets = [0, 96], sizes = [8, 32], strides = [1, 1]} : vector<8x128xf32> to vector<8x32xf32>
    %407 = math.tanh %405 : vector<8x32xf32>
    %408 = arith.mulf %406, %407 : vector<8x32xf32>
    %c7_i32_86 = arith.constant 7 : i32
    %409 = arith.cmpi sge, %c8_i32, %c7_i32_86 : i32
    %410 = arith.extui %409 : i1 to i32
    %c0_i32_87 = arith.constant 0 : i32
    %411 = arith.cmpi ne, %410, %c0_i32_87 : i32
    scf.if %411 {
      %c7_i32_108 = arith.constant 7 : i32
      %475 = arith.subi %c8_i32, %c7_i32_108 : i32
      %c8_i32_109 = arith.constant 8 : i32
      %476 = arith.muli %475, %c8_i32_109 : i32
      %477 = tpu.assume_multiple %476, 8 : i32
      %478 = arith.index_cast %477 : i32 to index
      %c0_110 = arith.constant 0 : index
      %479 = vector.load %arg8[%478, %c0_110] : memref<24x32xf32, #tpu.memory_space<vmem>>, vector<8x32xf32>
      tpu.vector_store %arg8[%478, %c0_110], %408 {strides = array<i32>} : memref<24x32xf32, #tpu.memory_space<vmem>>, vector<8x32xf32>,
    } else {
    }
    %c9_i32 = arith.constant 9 : i32
    %412 = arith.truncf %408 : vector<8x32xf32> to vector<8x32xbf16>
    %cst_88 = arith.constant dense<0.000000e+00> : vector<8x128xf32>
    %413 = tpu.matmul %412, %2, %cst_88 {dimension_numbers = #tpu.dot_dimension_numbers<[1], [0], [0], [1], [0, 0, 1, 1], [], []>} : vector<8x32xbf16>, vector<32x128xbf16>, vector<8x128xf32> -> vector<8x128xf32>
    %414 = arith.index_cast %c9_i32 : i32 to index
    %c0_89 = arith.constant 0 : index
    %c0_90 = arith.constant 0 : index
    %415 = vector.load %arg0[%414, %c0_89, %c0_90] : memref<10x8x128xf32, #tpu.memory_space<vmem>>, vector<1x8x128xf32>
    %416 = vector.shape_cast %415 : vector<1x8x128xf32> to vector<8x128xf32>
    %417 = arith.truncf %389 : vector<8x32xf32> to vector<8x32xbf16>
    %cst_91 = arith.constant dense<0.000000e+00> : vector<8x128xf32>
    %418 = tpu.matmul %417, %0, %cst_91 {dimension_numbers = #tpu.dot_dimension_numbers<[1], [0], [0], [1], [0, 0, 1, 1], [], []>} : vector<8x32xbf16>, vector<32x128xbf16>, vector<8x128xf32> -> vector<8x128xf32>
    %419 = arith.addf %416, %418 : vector<8x128xf32>
    %420 = arith.negf %419 : vector<8x128xf32>
    %421 = math.exp %420 : vector<8x128xf32>
    %cst_92 = arith.constant 1.000000e+00 : f32
    %422 = vector.broadcast %cst_92 : f32 to vector<8x128xf32>
    %423 = arith.addf %422, %421 : vector<8x128xf32>
    %424 = arith.divf %422, %423 : vector<8x128xf32>
    %425 = math.tanh %419 : vector<8x128xf32>
    %426 = vector.extract_strided_slice %424 {offsets = [0, 32], sizes = [8, 32], strides = [1, 1]} : vector<8x128xf32> to vector<8x32xf32>
    %427 = arith.mulf %426, %386 : vector<8x32xf32>
    %428 = vector.extract_strided_slice %424 {offsets = [0, 0], sizes = [8, 32], strides = [1, 1]} : vector<8x128xf32> to vector<8x32xf32>
    %429 = vector.extract_strided_slice %425 {offsets = [0, 64], sizes = [8, 32], strides = [1, 1]} : vector<8x128xf32> to vector<8x32xf32>
    %430 = arith.mulf %428, %429 : vector<8x32xf32>
    %431 = arith.addf %427, %430 : vector<8x32xf32>
    %432 = vector.extract_strided_slice %424 {offsets = [0, 96], sizes = [8, 32], strides = [1, 1]} : vector<8x128xf32> to vector<8x32xf32>
    %433 = math.tanh %431 : vector<8x32xf32>
    %434 = arith.mulf %432, %433 : vector<8x32xf32>
    %435 = arith.truncf %434 : vector<8x32xf32> to vector<8x32xbf16>
    %cst_93 = arith.constant dense<0.000000e+00> : vector<8x128xf32>
    %436 = tpu.matmul %435, %1, %cst_93 {dimension_numbers = #tpu.dot_dimension_numbers<[1], [0], [0], [1], [0, 0, 1, 1], [], []>} : vector<8x32xbf16>, vector<32x128xbf16>, vector<8x128xf32> -> vector<8x128xf32>
    %437 = arith.addf %436, %413 : vector<8x128xf32>
    %438 = arith.addf %437, %5 : vector<8x128xf32>
    %439 = arith.negf %438 : vector<8x128xf32>
    %440 = math.exp %439 : vector<8x128xf32>
    %cst_94 = arith.constant 1.000000e+00 : f32
    %441 = vector.broadcast %cst_94 : f32 to vector<8x128xf32>
    %442 = arith.addf %441, %440 : vector<8x128xf32>
    %443 = arith.divf %441, %442 : vector<8x128xf32>
    %444 = math.tanh %438 : vector<8x128xf32>
    %445 = vector.extract_strided_slice %443 {offsets = [0, 32], sizes = [8, 32], strides = [1, 1]} : vector<8x128xf32> to vector<8x32xf32>
    %446 = arith.mulf %445, %405 : vector<8x32xf32>
    %447 = vector.extract_strided_slice %443 {offsets = [0, 0], sizes = [8, 32], strides = [1, 1]} : vector<8x128xf32> to vector<8x32xf32>
    %448 = vector.extract_strided_slice %444 {offsets = [0, 64], sizes = [8, 32], strides = [1, 1]} : vector<8x128xf32> to vector<8x32xf32>
    %449 = arith.mulf %447, %448 : vector<8x32xf32>
    %450 = arith.addf %446, %449 : vector<8x32xf32>
    %451 = vector.extract_strided_slice %443 {offsets = [0, 96], sizes = [8, 32], strides = [1, 1]} : vector<8x128xf32> to vector<8x32xf32>
    %452 = math.tanh %450 : vector<8x32xf32>
    %453 = arith.mulf %451, %452 : vector<8x32xf32>
    %c7_i32_95 = arith.constant 7 : i32
    %454 = arith.cmpi sge, %c9_i32, %c7_i32_95 : i32
    %455 = arith.extui %454 : i1 to i32
    %c0_i32_96 = arith.constant 0 : i32
    %456 = arith.cmpi ne, %455, %c0_i32_96 : i32
    scf.if %456 {
      %c7_i32_108 = arith.constant 7 : i32
      %475 = arith.subi %c9_i32, %c7_i32_108 : i32
      %c8_i32_109 = arith.constant 8 : i32
      %476 = arith.muli %475, %c8_i32_109 : i32
      %477 = tpu.assume_multiple %476, 8 : i32
      %478 = arith.index_cast %477 : i32 to index
      %c0_110 = arith.constant 0 : index
      %479 = vector.load %arg8[%478, %c0_110] : memref<24x32xf32, #tpu.memory_space<vmem>>, vector<8x32xf32>
      tpu.vector_store %arg8[%478, %c0_110], %453 {strides = array<i32>} : memref<24x32xf32, #tpu.memory_space<vmem>>, vector<8x32xf32>,
    } else {
    }
    %c10_i32 = arith.constant 10 : i32
    %c0_97 = arith.constant 0 : index
    %c0_98 = arith.constant 0 : index
    %457 = vector.load %arg8[%c0_97, %c0_98] : memref<24x32xf32, #tpu.memory_space<vmem>>, vector<24x32xf32>
    %458 = arith.truncf %457 : vector<24x32xf32> to vector<24x32xbf16>
    %c0_99 = arith.constant 0 : index
    %c0_100 = arith.constant 0 : index
    %459 = vector.load %arg5[%c0_99, %c0_100] : memref<32x12xbf16, #tpu.memory_space<vmem>>, vector<32x12xbf16>
    %cst_101 = arith.constant dense<0.000000e+00> : vector<24x12xf32>
    %460 = tpu.matmul %458, %459, %cst_101 {dimension_numbers = #tpu.dot_dimension_numbers<[1], [0], [0], [1], [0, 0, 1, 1], [], []>} : vector<24x32xbf16>, vector<32x12xbf16>, vector<24x12xf32> -> vector<24x12xf32>
    %c0_102 = arith.constant 0 : index
    %c0_103 = arith.constant 0 : index
    %461 = vector.load %arg6[%c0_102, %c0_103] : memref<1x12xf32, #tpu.memory_space<vmem>>, vector<1x12xf32>
    %462 = vector.broadcast %461 : vector<1x12xf32> to vector<24x12xf32>
    %463 = arith.addf %460, %462 : vector<24x12xf32>
    %cst_104 = arith.constant dense<0xFF800000> : vector<24xf32>
    %464 = vector.multi_reduction <maximumf>, %463, %cst_104 [1] : vector<24x12xf32> to vector<24xf32>
    %465 = vector.shape_cast %464 : vector<24xf32> to vector<24x1xf32>
    %466 = vector.broadcast %465 : vector<24x1xf32> to vector<24x12xf32>
    %467 = arith.subf %463, %466 : vector<24x12xf32>
    %468 = math.exp %467 : vector<24x12xf32>
    %cst_105 = arith.constant dense<0.000000e+00> : vector<24xf32>
    %469 = vector.multi_reduction <add>, %468, %cst_105 [1] : vector<24x12xf32> to vector<24xf32>
    %470 = vector.shape_cast %469 : vector<24xf32> to vector<24x1xf32>
    %471 = tpu.reciprocal %470 {approx = true} : vector<24x1xf32> -> vector<24x1xf32>
    %472 = vector.broadcast %471 : vector<24x1xf32> to vector<24x12xf32>
    %473 = arith.mulf %468, %472 : vector<24x12xf32>
    %c0_106 = arith.constant 0 : index
    %c0_107 = arith.constant 0 : index
    %474 = vector.load %arg7[%c0_106, %c0_107] : memref<24x12xf32, #tpu.memory_space<vmem>>, vector<24x12xf32>
    tpu.vector_store %arg7[%c0_106, %c0_107], %473 {strides = array<i32>} : memref<24x12xf32, #tpu.memory_space<vmem>>, vector<24x12xf32>,
    return
  }
}

</mosaic_0001>

<bundles_post_ra>
// kernel: tpu_custom_call.1
= control target key start
LH: loop header
LB: loop body
LE: loop exit
PB: predicated region body
PF: predicated region fallthrough
CT: control target
= control target key end

     0   :  { %12 = vsyncpa [#allocation4], 0  ;;  %s3300_s0 = inlined_call_operand.hbm [shape: f32[10,8,128], index: 0, kind: input, shape index: {}]   ;;  %s3301_s1 = inlined_call_operand.vmem [shape: bf16[32,128], index: 1, kind: input, shape index: {}]   ;;  %s3302_s2 = inlined_call_operand.hbm [shape: bf16[32,128], index: 2, kind: input, shape index: {}]   ;;  %s3303_s3 = inlined_call_operand.hbm [shape: bf16[32,128], index: 3, kind: input, shape index: {}]   ;;  %s3304_s4 = inlined_call_operand.vmem [shape: f32[1,128], index: 4, kind: input, shape index: {}]   ;;  %s3305_s5 = inlined_call_operand.vmem [shape: bf16[32,12], index: 5, kind: input, shape index: {}]   ;;  %s3306_s6 = inlined_call_operand.vmem [shape: f32[1,12], index: 6, kind: input, shape index: {}]   ;;  %s3307_s7 = inlined_call_operand.vmem [shape: f32[24,12], index: 7, kind: output, shape index: {}]  }
   0x1   :  { %13 = vsyncpa [#allocation6], 0  ;;  %s2785_s24 = smov [#allocation5]  }
   0x2   :  { %s33_s25 = sshll.u32 %s2785_s24, 4  ;;  %s34_s25 = int_to_ptr.vmem [resolvable:$true] %s33_s25 }
   0x3   :  { %s2729_s26 = scalar_lea.vmem %s34_s25, 256  ;;  %p2734_p1 = scmp.lt.s32.totalorder %s34_s25, %s34_s25 }
   0x4   :  { %p2730_p0 = scmp.ne.s32.totalorder %s34_s25, %s2729_s26  ;;  %p2735_p2 = scmp.lt.s32.totalorder %s2729_s26, %s2729_s26 }
   0x6   :  { %p2736_p3 = por %p2735_p2, %p2734_p1 }
   0x8   :  { %p2737_p4 = pnand %p2736_p3, %p2730_p0 }
   0xa   :  { %2740 = shalt.err (!%p2737_p4)
}
   0xb   :  { %s2786_s27 = smov 64   ;;  %s2787_s28 = smov 4  }
   0xc   :  { %39 = dma.hbm_to_vmem [thread:$0]  %s3302_s2, 256, %s34_s25, [#allocation6], %s2786_s27, %s2786_s27, %s2787_s28  }
   0xd   :  { %s2788_s8 = smov [#allocation3]  }
   0xe   :  { %s19_s9 = sshll.u32 %s2788_s8, 4  ;;  %s20_s9 = int_to_ptr.vmem [resolvable:$true] %s19_s9 }
   0xf   :  { %s2749_s10 = scalar_lea.vmem %s20_s9, 1280  ;;  %p2754_p6 = scmp.lt.s32.totalorder %s20_s9, %s20_s9 }
  0x10   :  { %p2750_p5 = scmp.ne.s32.totalorder %s20_s9, %s2749_s10  ;;  %p2755_p7 = scmp.lt.s32.totalorder %s2749_s10, %s2749_s10 }
  0x12   :  { %p2756_p8 = por %p2755_p7, %p2754_p6 }
  0x14   :  { %p2757_p9 = pnand %p2756_p8, %p2750_p5 }
  0x16   :  { %2760 = shalt.err (!%p2757_p9)
}
  0x17   :  { %s2789_s11 = smov 128   ;;  %s2790_s12 = smov 8  }
  0x18   :  { %25 = dma.hbm_to_vmem [thread:$0]  %s3300_s0, 1280, %s20_s9, [#allocation4], %s2789_s11, %s2789_s11, %s2790_s12  }
  0x19   :  { %s2791_s15 = smov [#allocation7]  }
  0x1a   :  { %s45_s16 = sshll.u32 %s2791_s15, 4  ;;  %s46_s16 = int_to_ptr.vmem [resolvable:$true] %s45_s16 }
  0x1b   :  { %s2769_s2 = scalar_lea.vmem %s46_s16, 256  ;;  %p2774_p11 = scmp.lt.s32.totalorder %s46_s16, %s46_s16 }
  0x1c   :  { %p2770_p10 = scmp.ne.s32.totalorder %s46_s16, %s2769_s2  ;;  %p2775_p12 = scmp.lt.s32.totalorder %s2769_s2, %s2769_s2 }
  0x1e   :  { %p2776_p13 = por %p2775_p12, %p2774_p11 }
  0x20   :  { %p2777_p0 = pnand %p2776_p13, %p2770_p10 }
  0x22   :  { %2780 = shalt.err (!%p2777_p0)
}
  0x23   :  { %51 = dma.hbm_to_vmem [thread:$0]  %s3303_s3, 256, %s46_s16, [#allocation6], %s2786_s27, %s2786_s27, %s2787_s28  }
  0x24   :  { %2781 = dma.done.wait [#allocation4], 1280  }
  0x25   :  { %2782 = vsyncadd [#allocation4], 4294966016 }
  0x26   :  { %2783 = dma.done.wait [#allocation6], 512  }
  0x27   :  { %2784 = vsyncadd [#allocation6], 4294966784  ;;  %v2792_v0 = vmov 0.0   ;;  %vm2793_vm0 = vmmov 0   ;;  %v2858_v1 = vld [vmem:[%s3301_s1 + $0x8] sm:$0xff]   ;;  %v2864_v2 = vld [vmem:[%s3301_s1] sm:$0xff]  }
  0x28   :  { %2283 = vmatprep.subr.bf16.mxu1 %v2792_v0  ;;  %2287 = vmatprep.mubr.msk.bf16.mxu1 %vm2793_vm0, %v2792_v0  ;;  %v2794_v3 = vmov 0   ;;  %v143_v4 = vld [vmem:[#allocation3] sm:$0xff]  ;;  %s2795_s21 = smov 32   ;;  %v2876_v20 = vld [vmem:[#allocation7 + $0x8] sm:$0xff]   ;;  %v2885_v22 = vld [vmem:[#allocation5 + $0x8] sm:$0xff]   ;;  %vm99_vm1 = vcmask 261120  }
  0x29   :  { %2275 = vmatprep.subr.bf16.mxu0 %v2792_v0  ;;  %2279 = vmatprep.mubr.msk.bf16.mxu0 %vm2793_vm0, %v2792_v0  ;;  %v2879_v21 = vld [vmem:[#allocation7] sm:$0xff]   ;;  %v2892_v24 = vld [vmem:[#allocation5] sm:$0xff]   ;;  %v2917_v33 = vld [vmem:[%s3304_s4] ss:$0 sm:$0xff]  ;;  %vm2078_vm2 = vcmask 97280  }
  0x2a   :  { %2284 = vmatpush3.bf16.msra.mxu1 %v2858_v1  ;;  %2276 = vmatpush3.bf16.msra.mxu0 %v2876_v20  ;;  %v353_v40 = vld [vmem:[#allocation3 + $0x8] sm:$0xff] }
  0x2b   :  { %2285 = vmatprep.subr.bf16.mxu1 %v2792_v0  ;;  %2277 = vmatprep.subr.bf16.mxu0 %v2792_v0 }
  0x2e   :  { %2286 = vmatpush3.bf16.msra.mxu1 %v2864_v2  ;;  %2278 = vmatpush3.bf16.msra.mxu0 %v2879_v21 }
  0x2f   :  { %2299 = vmatprep.subr.bf16.mxu1 %v2792_v0  ;;  %2291 = vmatprep.subr.bf16.mxu0 %v2792_v0 }
  0x31   :  { %2288 = vmatmul.mubr.bf16.vlgmr.msra.gmra.mxu1 %v2794_v3  ;;  %2280 = vmatmul.mubr.bf16.vlgmr.msra.gmra.mxu0 %v2794_v3 }
  0x32   :  { %2303 = vmatprep.mubr.msk.bf16.mxu1 %vm2793_vm0, %v2792_v0  ;;  %2300 = vmatpush3.bf16.msra.mxu1 %v2876_v20 }
  0x33   :  { %2301 = vmatprep.subr.bf16.mxu1 %v2792_v0  ;;  %2292 = vmatpush3.bf16.msra.mxu0 %v2885_v22 }
  0x34   :  { %2295 = vmatprep.mubr.msk.bf16.mxu0 %vm2793_vm0, %v2792_v0  ;;  %2293 = vmatprep.subr.bf16.mxu0 %v2792_v0 }
  0x36   :  { %2302 = vmatpush3.bf16.msra.mxu1 %v2879_v21 }
  0x37   :  { %2315 = vmatprep.subr.bf16.mxu1 %v2792_v0  ;;  %2294 = vmatpush3.bf16.msra.mxu0 %v2892_v24 }
  0x38   :  { %2307 = vmatprep.subr.bf16.mxu0 %v2792_v0 }
  0xf1   :  { %v190_v5 = vpop.f32.mrf.mxu1  ;;  %v137_v28 = vpop.f32.mrf.mxu0 }
  0xf2   :  { %v196_v6 = vadd.f32 %v190_v5, %v143_v4 }
  0xf3   :  { %v2289_v7 = vpop.f32.mrf.mxu1  ;;  %v2281_v29 = vpop.f32.mrf.mxu0 }
  0xf4   :  { %2542 = vtanh.f32 %v196_v6  ;;  %v2126_v11 = vmul.f32 -1.442695, %v196_v6  ;;  %v539_v29 = vld [vmem:[#allocation3 + $0x10] sm:$0xff] }
  0xf5   :  { %v193_v8 = vpop.f32.mrf.mxu1  ;;  %v140_v30 = vpop.f32.mrf.mxu0 }
  0xf6   :  { %2544 = vpow2.f32 %v2126_v11 }
  0xf7   :  { %v2290_v9 = vpop.f32.mrf.mxu1  ;;  %v2282_v31 = vpop.f32.mrf.mxu0 }
 0x101   :  { %v2543_v10 = vpop.eup %2542 }
 0x102   :  { %206 = vrot.lane.b32.xlu0 %v2543_v10, %s2786_s27 }
 0x103   :  { %v2545_v12 = vpop.eup %2544 }
 0x104   :  { %v200_v13 = vadd.f32 1.0, %v2545_v12 }
 0x106   :  { %2546 = vrcp.f32 %v200_v13 }
 0x113   :  { %v2547_v14 = vpop.eup %2546 }
 0x114   :  { %v204_v17 = vmul.f32 0.0, %v2547_v14 }
 0x174   :  { %v207_v15 = vpop.permute.xlu0 %206 }
 0x175   :  { %v209_v16 = vmul.f32 %v2547_v14, %v207_v15 }
 0x177   :  { %211 = vrot.lane.b32.xlu0 %v209_v16, %s2795_s21 }
 0x1e9   :  { %v212_v18 = vpop.permute.xlu0 %211 }
 0x1ea   :  { %v2873_v19 = vadd.f32 %v212_v18, %v204_v17 }
 0x1ec   :  { %2548 = vtanh.f32 %v2873_v19 }
 0x1f9   :  { %v2549_v23 = vpop.eup %2548 }
 0x1fa   :  { %217 = vrot.lane.b32.xlu1 %v2549_v23, %s2786_s27 }
 0x26c   :  { %v218_v25 = vpop.permute.xlu1 %217 }
 0x26d   :  { %v220_v26 = vmul.f32 %v2547_v14, %v218_v25 }
 0x26f   :  { %v221_v27 = vpack.c.bf16 %v220_v26, %v220_v26 }
 0x271   :  { %223 = vrot.lane.b32.xlu1 %v221_v27, %s2795_s21 }
 0x2e3   :  { %v224_v32 = vpop.permute.xlu1 %223 }
 0x2e4   :  { %2296 = vmatmul.mubr.msk.bf16.vlgmr.msra.gmra.mxu0 %vm99_vm1, %v224_v32 }
 0x2e5   :  { %2308 = vmatpush3.bf16.msra.mxu0 %v2858_v1  ;;  %2311 = vmatprep.mubr.msk.bf16.mxu0 %vm2793_vm0, %v2792_v0 }
 0x2e6   :  { %2309 = vmatprep.subr.bf16.mxu0 %v2792_v0 }
 0x2e9   :  { %2310 = vmatpush3.bf16.msra.mxu0 %v2864_v2 }
 0x2ea   :  { %2323 = vmatprep.subr.bf16.mxu0 %v2792_v0 }
 0x2ec   :  { %2312 = vmatmul.mubr.msk.bf16.vlgmr.msra.gmra.mxu0 %vm99_vm1, %v224_v32 }
 0x2ed   :  { %2324 = vmatpush3.bf16.msra.mxu0 %v2876_v20  ;;  %2327 = vmatprep.mubr.msk.bf16.mxu0 %vm2793_vm0, %v2792_v0 }
 0x2ee   :  { %2325 = vmatprep.subr.bf16.mxu0 %v2792_v0 }
 0x2f1   :  { %2326 = vmatpush3.bf16.msra.mxu0 %v2879_v21 }
 0x2f2   :  { %2339 = vmatprep.subr.bf16.mxu0 %v2792_v0 }
 0x3a4   :  { %v274_v34 = vpop.f32.mrf.mxu0 }
 0x3a5   :  { %v275_v35 = vadd.f32 %v274_v34, %v137_v28 }
 0x3a6   :  { %v2297_v36 = vpop.f32.mrf.mxu0 }
 0x3a7   :  { %v280_v37 = vadd.f32 %v2917_v33, %v275_v35 }
 0x3a8   :  { %v277_v38 = vpop.f32.mrf.mxu0 }
 0x3a9   :  { %2550 = vtanh.f32 %v280_v37  ;;  %v2130_v48 = vmul.f32 -1.442695, %v280_v37 }
 0x3aa   :  { %v2298_v39 = vpop.f32.mrf.mxu0 }
 0x3ac   :  { %v388_v41 = vpop.f32.mrf.mxu0 }
 0x3ad   :  { %v394_v42 = vadd.f32 %v388_v41, %v353_v40 }
 0x3ae   :  { %v2313_v43 = vpop.f32.mrf.mxu0 }
 0x3af   :  { %2552 = vtanh.f32 %v394_v42  ;;  %v2133_v49 = vmul.f32 -1.442695, %v394_v42 }
 0x3b0   :  { %v391_v44 = vpop.f32.mrf.mxu0  ;;  %2554 = vpow2.f32 %v2130_v48 }
 0x3b1   :  { %2556 = vpow2.f32 %v2133_v49 }
 0x3b2   :  { %v2314_v45 = vpop.f32.mrf.mxu0 }
 0x3b6   :  { %v2551_v46 = vpop.eup %2550 }
 0x3b7   :  { %290 = vrot.lane.b32.xlu0 %v2551_v46, %s2786_s27 }
 0x3bc   :  { %v2553_v47 = vpop.eup %2552 }
 0x3bd   :  { %404 = vrot.lane.b32.xlu1 %v2553_v47, %s2786_s27  ;;  %v2555_v50 = vpop.eup %2554 }
 0x3be   :  { %v284_v51 = vadd.f32 1.0, %v2555_v50  ;;  %v2557_v52 = vpop.eup %2556 }
 0x3bf   :  { %v398_v53 = vadd.f32 1.0, %v2557_v52 }
 0x3c0   :  { %2558 = vrcp.f32 %v284_v51 }
 0x3c1   :  { %2560 = vrcp.f32 %v398_v53 }
 0x3cd   :  { %v2559_v54 = vpop.eup %2558 }
 0x3ce   :  { %v2561_v57 = vpop.eup %2560  ;;  %v288_v60 = vmul.f32 0.0, %v2559_v54 }
 0x3cf   :  { %v402_v63 = vmul.f32 %v2561_v57, %v2873_v19 }
 0x429   :  { %v291_v55 = vpop.permute.xlu0 %290 }
 0x42a   :  { %v293_v56 = vmul.f32 %v2559_v54, %v291_v55 }
 0x42c   :  { %295 = vrot.lane.b32.xlu0 %v293_v56, %s2795_s21 }
 0x42f   :  { %v405_v58 = vpop.permute.xlu1 %404 }
 0x430   :  { %v407_v59 = vmul.f32 %v2561_v57, %v405_v58 }
 0x432   :  { %409 = vrot.lane.b32.xlu1 %v407_v59, %s2795_s21 }
 0x49e   :  { %v296_v61 = vpop.permute.xlu0 %295 }
 0x49f   :  { %v2924_v62 = vadd.f32 %v296_v61, %v288_v60 }
 0x4a1   :  { %2562 = vtanh.f32 %v2924_v62 }
 0x4a4   :  { %v410_v3 = vpop.permute.xlu1 %409 }
 0x4a5   :  { %v2928_v4 = vadd.f32 %v410_v3, %v402_v63 }
 0x4a7   :  { %2564 = vtanh.f32 %v2928_v4 }
 0x4ae   :  { %v2563_v5 = vpop.eup %2562 }
 0x4af   :  { %301 = vrot.lane.b32.xlu0 %v2563_v5, %s2786_s27 }
 0x4b4   :  { %v2565_v6 = vpop.eup %2564 }
 0x4b5   :  { %415 = vrot.lane.b32.xlu1 %v2565_v6, %s2786_s27 }
 0x521   :  { %v302_v7 = vpop.permute.xlu0 %301 }
 0x522   :  { %v304_v8 = vmul.f32 %v2559_v54, %v302_v7 }
 0x524   :  { %v305_v9 = vpack.c.bf16 %v304_v8, %v304_v8 }
 0x526   :  { %307 = vrot.lane.b32.xlu0 %v305_v9, %s2795_s21 }
 0x527   :  { %v416_v10 = vpop.permute.xlu1 %415 }
 0x528   :  { %v418_v11 = vmul.f32 %v2561_v57, %v416_v10 }
 0x52a   :  { %v419_v12 = vpack.c.bf16 %v418_v11, %v418_v11 }
 0x52c   :  { %421 = vrot.lane.b32.xlu1 %v419_v12, %s2795_s21 }
 0x598   :  { %v308_v13 = vpop.permute.xlu0 %307 }
 0x599   :  { %2304 = vmatmul.mubr.msk.bf16.vlgmr.msra.gmra.mxu1 %vm99_vm1, %v308_v13 }
 0x59a   :  { %2316 = vmatpush3.bf16.msra.mxu1 %v2885_v22  ;;  %2319 = vmatprep.mubr.msk.bf16.mxu1 %vm2793_vm0, %v2792_v0 }
 0x59b   :  { %2317 = vmatprep.subr.bf16.mxu1 %v2792_v0 }
 0x59e   :  { %2318 = vmatpush3.bf16.msra.mxu1 %v2892_v24  ;;  %v422_v14 = vpop.permute.xlu1 %421 }
 0x59f   :  { %2331 = vmatprep.subr.bf16.mxu1 %v2792_v0 }
 0x5a1   :  { %2320 = vmatmul.mubr.msk.bf16.vlgmr.msra.gmra.mxu1 %vm99_vm1, %v422_v14 }
 0x5a2   :  { %2332 = vmatpush3.bf16.msra.mxu1 %v2858_v1  ;;  %2335 = vmatprep.mubr.msk.bf16.mxu1 %vm2793_vm0, %v2792_v0 }
 0x5a3   :  { %2333 = vmatprep.subr.bf16.mxu1 %v2792_v0 }
 0x5a6   :  { %2334 = vmatpush3.bf16.msra.mxu1 %v2864_v2 }
 0x5a7   :  { %2347 = vmatprep.subr.bf16.mxu1 %v2792_v0 }
 0x5a9   :  { %2336 = vmatmul.mubr.msk.bf16.vlgmr.msra.gmra.mxu1 %vm99_vm1, %v422_v14 }
 0x5aa   :  { %2348 = vmatpush3.bf16.msra.mxu1 %v2876_v20  ;;  %2351 = vmatprep.mubr.msk.bf16.mxu1 %vm2793_vm0, %v2792_v0 }
 0x5ab   :  { %2349 = vmatprep.subr.bf16.mxu1 %v2792_v0 }
 0x5ae   :  { %2350 = vmatpush3.bf16.msra.mxu1 %v2879_v21 }
 0x5af   :  { %2363 = vmatprep.subr.bf16.mxu1 %v2792_v0 }
 0x659   :  { %v346_v15 = vpop.f32.mrf.mxu1 }
 0x65b   :  { %v2305_v16 = vpop.f32.mrf.mxu1 }
 0x65d   :  { %v349_v17 = vpop.f32.mrf.mxu1 }
 0x65f   :  { %v2306_v18 = vpop.f32.mrf.mxu1 }
 0x661   :  { %v460_v19 = vpop.f32.mrf.mxu1 }
 0x662   :  { %v461_v23 = vadd.f32 %v460_v19, %v346_v15  ;;  %v725_v15 = vld [vmem:[#allocation3 + $0x18] sm:$0xff] }
 0x663   :  { %v2321_v25 = vpop.f32.mrf.mxu1 }
 0x664   :  { %v466_v26 = vadd.f32 %v2917_v33, %v461_v23 }
 0x665   :  { %v463_v27 = vpop.f32.mrf.mxu1 }
 0x666   :  { %2566 = vtanh.f32 %v466_v26  ;;  %v2135_v38 = vmul.f32 -1.442695, %v466_v26 }
 0x667   :  { %v2322_v28 = vpop.f32.mrf.mxu1 }
 0x669   :  { %v574_v30 = vpop.f32.mrf.mxu1 }
 0x66a   :  { %v580_v31 = vadd.f32 %v574_v30, %v539_v29 }
 0x66b   :  { %v2337_v32 = vpop.f32.mrf.mxu1 }
 0x66c   :  { %2568 = vtanh.f32 %v580_v31  ;;  %v2138_v39 = vmul.f32 -1.442695, %v580_v31 }
 0x66d   :  { %v577_v34 = vpop.f32.mrf.mxu1  ;;  %2570 = vpow2.f32 %v2135_v38 }
 0x66e   :  { %2572 = vpow2.f32 %v2138_v39 }
 0x66f   :  { %v2338_v35 = vpop.f32.mrf.mxu1 }
 0x673   :  { %v2567_v36 = vpop.eup %2566 }
 0x674   :  { %476 = vrot.lane.b32.xlu0 %v2567_v36, %s2786_s27 }
 0x679   :  { %v2569_v37 = vpop.eup %2568 }
 0x67a   :  { %590 = vrot.lane.b32.xlu1 %v2569_v37, %s2786_s27  ;;  %v2571_v40 = vpop.eup %2570 }
 0x67b   :  { %v470_v41 = vadd.f32 1.0, %v2571_v40  ;;  %v2573_v42 = vpop.eup %2572 }
 0x67c   :  { %v584_v43 = vadd.f32 1.0, %v2573_v42 }
 0x67d   :  { %2574 = vrcp.f32 %v470_v41 }
 0x67e   :  { %2576 = vrcp.f32 %v584_v43 }
 0x68a   :  { %v2575_v44 = vpop.eup %2574 }
 0x68b   :  { %v2577_v47 = vpop.eup %2576  ;;  %v474_v50 = vmul.f32 %v2575_v44, %v2924_v62 }
 0x68c   :  { %v588_v53 = vmul.f32 %v2577_v47, %v2928_v4 }
 0x6e6   :  { %v477_v45 = vpop.permute.xlu0 %476 }
 0x6e7   :  { %v479_v46 = vmul.f32 %v2575_v44, %v477_v45 }
 0x6e9   :  { %481 = vrot.lane.b32.xlu0 %v479_v46, %s2795_s21 }
 0x6ec   :  { %v591_v48 = vpop.permute.xlu1 %590 }
 0x6ed   :  { %v593_v49 = vmul.f32 %v2577_v47, %v591_v48 }
 0x6ef   :  { %595 = vrot.lane.b32.xlu1 %v593_v49, %s2795_s21 }
 0x75b   :  { %v482_v51 = vpop.permute.xlu0 %481 }
 0x75c   :  { %v2962_v52 = vadd.f32 %v482_v51, %v474_v50 }
 0x75e   :  { %2578 = vtanh.f32 %v2962_v52 }
 0x761   :  { %v596_v54 = vpop.permute.xlu1 %595 }
 0x762   :  { %v2966_v55 = vadd.f32 %v596_v54, %v588_v53 }
 0x764   :  { %2580 = vtanh.f32 %v2966_v55 }
 0x76b   :  { %v2579_v56 = vpop.eup %2578 }
 0x76c   :  { %487 = vrot.lane.b32.xlu0 %v2579_v56, %s2786_s27 }
 0x771   :  { %v2581_v57 = vpop.eup %2580 }
 0x772   :  { %601 = vrot.lane.b32.xlu1 %v2581_v57, %s2786_s27 }
 0x7de   :  { %v488_v58 = vpop.permute.xlu0 %487 }
 0x7df   :  { %v490_v59 = vmul.f32 %v2575_v44, %v488_v58 }
 0x7e1   :  { %v491_v60 = vpack.c.bf16 %v490_v59, %v490_v59 }
 0x7e3   :  { %493 = vrot.lane.b32.xlu0 %v491_v60, %s2795_s21 }
 0x7e4   :  { %v602_v61 = vpop.permute.xlu1 %601 }
 0x7e5   :  { %v604_v62 = vmul.f32 %v2577_v47, %v602_v61 }
 0x7e7   :  { %v605_v63 = vpack.c.bf16 %v604_v62, %v604_v62 }
 0x7e9   :  { %607 = vrot.lane.b32.xlu1 %v605_v63, %s2795_s21 }
 0x855   :  { %v494_v3 = vpop.permute.xlu0 %493 }
 0x856   :  { %2328 = vmatmul.mubr.msk.bf16.vlgmr.msra.gmra.mxu0 %vm99_vm1, %v494_v3 }
 0x857   :  { %2340 = vmatpush3.bf16.msra.mxu0 %v2885_v22  ;;  %2343 = vmatprep.mubr.msk.bf16.mxu0 %vm2793_vm0, %v2792_v0 }
 0x858   :  { %2341 = vmatprep.subr.bf16.mxu0 %v2792_v0 }
 0x85b   :  { %2342 = vmatpush3.bf16.msra.mxu0 %v2892_v24  ;;  %v608_v4 = vpop.permute.xlu1 %607 }
 0x85c   :  { %2355 = vmatprep.subr.bf16.mxu0 %v2792_v0 }
 0x85e   :  { %2344 = vmatmul.mubr.msk.bf16.vlgmr.msra.gmra.mxu0 %vm99_vm1, %v608_v4 }
 0x85f   :  { %2356 = vmatpush3.bf16.msra.mxu0 %v2858_v1  ;;  %2359 = vmatprep.mubr.msk.bf16.mxu0 %vm2793_vm0, %v2792_v0 }
 0x860   :  { %2357 = vmatprep.subr.bf16.mxu0 %v2792_v0 }
 0x863   :  { %2358 = vmatpush3.bf16.msra.mxu0 %v2864_v2 }
 0x864   :  { %2371 = vmatprep.subr.bf16.mxu0 %v2792_v0 }
 0x866   :  { %2360 = vmatmul.mubr.msk.bf16.vlgmr.msra.gmra.mxu0 %vm99_vm1, %v608_v4 }
 0x867   :  { %2372 = vmatpush3.bf16.msra.mxu0 %v2876_v20  ;;  %2375 = vmatprep.mubr.msk.bf16.mxu0 %vm2793_vm0, %v2792_v0 }
 0x868   :  { %2373 = vmatprep.subr.bf16.mxu0 %v2792_v0 }
 0x86b   :  { %2374 = vmatpush3.bf16.msra.mxu0 %v2879_v21 }
 0x86c   :  { %2387 = vmatprep.subr.bf16.mxu0 %v2792_v0 }
 0x916   :  { %v532_v5 = vpop.f32.mrf.mxu0 }
 0x918   :  { %v2329_v6 = vpop.f32.mrf.mxu0 }
 0x91a   :  { %v535_v7 = vpop.f32.mrf.mxu0 }
 0x91c   :  { %v2330_v8 = vpop.f32.mrf.mxu0 }
 0x91e   :  { %v646_v9 = vpop.f32.mrf.mxu0 }
 0x91f   :  { %v647_v10 = vadd.f32 %v646_v9, %v532_v5  ;;  %v911_v5 = vld [vmem:[#allocation3 + $0x20] sm:$0xff] }
 0x920   :  { %v2345_v11 = vpop.f32.mrf.mxu0 }
 0x921   :  { %v652_v12 = vadd.f32 %v2917_v33, %v647_v10 }
 0x922   :  { %v649_v13 = vpop.f32.mrf.mxu0 }
 0x923   :  { %2582 = vtanh.f32 %v652_v12  ;;  %v2140_v27 = vmul.f32 -1.442695, %v652_v12 }
 0x924   :  { %v2346_v14 = vpop.f32.mrf.mxu0 }
 0x926   :  { %v760_v16 = vpop.f32.mrf.mxu0 }
 0x927   :  { %v766_v17 = vadd.f32 %v760_v16, %v725_v15 }
 0x928   :  { %v2361_v18 = vpop.f32.mrf.mxu0 }
 0x929   :  { %2584 = vtanh.f32 %v766_v17  ;;  %v2143_v28 = vmul.f32 -1.442695, %v766_v17 }
 0x92a   :  { %v763_v19 = vpop.f32.mrf.mxu0  ;;  %2586 = vpow2.f32 %v2140_v27 }
 0x92b   :  { %2588 = vpow2.f32 %v2143_v28 }
 0x92c   :  { %v2362_v23 = vpop.f32.mrf.mxu0 }
 0x930   :  { %v2583_v25 = vpop.eup %2582 }
 0x931   :  { %662 = vrot.lane.b32.xlu0 %v2583_v25, %s2786_s27 }
 0x936   :  { %v2585_v26 = vpop.eup %2584 }
 0x937   :  { %776 = vrot.lane.b32.xlu1 %v2585_v26, %s2786_s27  ;;  %v2587_v29 = vpop.eup %2586 }
 0x938   :  { %v656_v30 = vadd.f32 1.0, %v2587_v29  ;;  %v2589_v31 = vpop.eup %2588 }
 0x939   :  { %v770_v32 = vadd.f32 1.0, %v2589_v31 }
 0x93a   :  { %2590 = vrcp.f32 %v656_v30 }
 0x93b   :  { %2592 = vrcp.f32 %v770_v32 }
 0x947   :  { %v2591_v34 = vpop.eup %2590 }
 0x948   :  { %v2593_v37 = vpop.eup %2592  ;;  %v660_v40 = vmul.f32 %v2591_v34, %v2962_v52 }
 0x949   :  { %v774_v43 = vmul.f32 %v2593_v37, %v2966_v55 }
 0x9a3   :  { %v663_v35 = vpop.permute.xlu0 %662 }
 0x9a4   :  { %v665_v36 = vmul.f32 %v2591_v34, %v663_v35 }
 0x9a6   :  { %667 = vrot.lane.b32.xlu0 %v665_v36, %s2795_s21 }
 0x9a9   :  { %v777_v38 = vpop.permute.xlu1 %776 }
 0x9aa   :  { %v779_v39 = vmul.f32 %v2593_v37, %v777_v38 }
 0x9ac   :  { %781 = vrot.lane.b32.xlu1 %v779_v39, %s2795_s21 }
 0xa18   :  { %v668_v41 = vpop.permute.xlu0 %667 }
 0xa19   :  { %v3000_v42 = vadd.f32 %v668_v41, %v660_v40 }
 0xa1b   :  { %2594 = vtanh.f32 %v3000_v42 }
 0xa1e   :  { %v782_v44 = vpop.permute.xlu1 %781 }
 0xa1f   :  { %v3004_v45 = vadd.f32 %v782_v44, %v774_v43 }
 0xa21   :  { %2596 = vtanh.f32 %v3004_v45 }
 0xa28   :  { %v2595_v46 = vpop.eup %2594 }
 0xa29   :  { %673 = vrot.lane.b32.xlu0 %v2595_v46, %s2786_s27 }
 0xa2e   :  { %v2597_v47 = vpop.eup %2596 }
 0xa2f   :  { %787 = vrot.lane.b32.xlu1 %v2597_v47, %s2786_s27 }
 0xa9b   :  { %v674_v48 = vpop.permute.xlu0 %673 }
 0xa9c   :  { %v676_v49 = vmul.f32 %v2591_v34, %v674_v48 }
 0xa9e   :  { %v677_v50 = vpack.c.bf16 %v676_v49, %v676_v49 }
 0xaa0   :  { %679 = vrot.lane.b32.xlu0 %v677_v50, %s2795_s21 }
 0xaa1   :  { %v788_v51 = vpop.permute.xlu1 %787 }
 0xaa2   :  { %v790_v52 = vmul.f32 %v2593_v37, %v788_v51 }
 0xaa4   :  { %v791_v53 = vpack.c.bf16 %v790_v52, %v790_v52 }
 0xaa6   :  { %793 = vrot.lane.b32.xlu1 %v791_v53, %s2795_s21 }
 0xb12   :  { %v680_v54 = vpop.permute.xlu0 %679 }
 0xb13   :  { %2352 = vmatmul.mubr.msk.bf16.vlgmr.msra.gmra.mxu1 %vm99_vm1, %v680_v54 }
 0xb14   :  { %2364 = vmatpush3.bf16.msra.mxu1 %v2885_v22  ;;  %2367 = vmatprep.mubr.msk.bf16.mxu1 %vm2793_vm0, %v2792_v0 }
 0xb15   :  { %2365 = vmatprep.subr.bf16.mxu1 %v2792_v0 }
 0xb18   :  { %2366 = vmatpush3.bf16.msra.mxu1 %v2892_v24  ;;  %v794_v55 = vpop.permute.xlu1 %793 }
 0xb19   :  { %2379 = vmatprep.subr.bf16.mxu1 %v2792_v0 }
 0xb1b   :  { %2368 = vmatmul.mubr.msk.bf16.vlgmr.msra.gmra.mxu1 %vm99_vm1, %v794_v55 }
 0xb1c   :  { %2380 = vmatpush3.bf16.msra.mxu1 %v2858_v1  ;;  %2383 = vmatprep.mubr.msk.bf16.mxu1 %vm2793_vm0, %v2792_v0 }
 0xb1d   :  { %2381 = vmatprep.subr.bf16.mxu1 %v2792_v0 }
 0xb20   :  { %2382 = vmatpush3.bf16.msra.mxu1 %v2864_v2 }
 0xb21   :  { %2395 = vmatprep.subr.bf16.mxu1 %v2792_v0 }
 0xb23   :  { %2384 = vmatmul.mubr.msk.bf16.vlgmr.msra.gmra.mxu1 %vm99_vm1, %v794_v55 }
 0xb24   :  { %2396 = vmatpush3.bf16.msra.mxu1 %v2876_v20  ;;  %2399 = vmatprep.mubr.msk.bf16.mxu1 %vm2793_vm0, %v2792_v0 }
 0xb25   :  { %2397 = vmatprep.subr.bf16.mxu1 %v2792_v0 }
 0xb28   :  { %2398 = vmatpush3.bf16.msra.mxu1 %v2879_v21 }
 0xb29   :  { %2411 = vmatprep.subr.bf16.mxu1 %v2792_v0 }
 0xbd3   :  { %v718_v56 = vpop.f32.mrf.mxu1 }
 0xbd5   :  { %v2353_v57 = vpop.f32.mrf.mxu1 }
 0xbd7   :  { %v721_v58 = vpop.f32.mrf.mxu1 }
 0xbd9   :  { %v2354_v59 = vpop.f32.mrf.mxu1 }
 0xbdb   :  { %v832_v60 = vpop.f32.mrf.mxu1 }
 0xbdc   :  { %v833_v61 = vadd.f32 %v832_v60, %v718_v56  ;;  %v1097_v56 = vld [vmem:[#allocation3 + $0x28] sm:$0xff] }
 0xbdd   :  { %v2369_v62 = vpop.f32.mrf.mxu1 }
 0xbde   :  { %v838_v63 = vadd.f32 %v2917_v33, %v833_v61 }
 0xbdf   :  { %v835_v3 = vpop.f32.mrf.mxu1 }
 0xbe0   :  { %2598 = vtanh.f32 %v838_v63  ;;  %v2145_v13 = vmul.f32 -1.442695, %v838_v63 }
 0xbe1   :  { %v2370_v4 = vpop.f32.mrf.mxu1 }
 0xbe3   :  { %v946_v6 = vpop.f32.mrf.mxu1 }
 0xbe4   :  { %v952_v7 = vadd.f32 %v946_v6, %v911_v5 }
 0xbe5   :  { %v2385_v8 = vpop.f32.mrf.mxu1 }
 0xbe6   :  { %2600 = vtanh.f32 %v952_v7  ;;  %v2148_v14 = vmul.f32 -1.442695, %v952_v7 }
 0xbe7   :  { %v949_v9 = vpop.f32.mrf.mxu1  ;;  %2602 = vpow2.f32 %v2145_v13 }
 0xbe8   :  { %2604 = vpow2.f32 %v2148_v14 }
 0xbe9   :  { %v2386_v10 = vpop.f32.mrf.mxu1 }
 0xbed   :  { %v2599_v11 = vpop.eup %2598 }
 0xbee   :  { %848 = vrot.lane.b32.xlu0 %v2599_v11, %s2786_s27 }
 0xbf3   :  { %v2601_v12 = vpop.eup %2600 }
 0xbf4   :  { %962 = vrot.lane.b32.xlu1 %v2601_v12, %s2786_s27  ;;  %v2603_v15 = vpop.eup %2602 }
 0xbf5   :  { %v842_v16 = vadd.f32 1.0, %v2603_v15  ;;  %v2605_v17 = vpop.eup %2604 }
 0xbf6   :  { %v956_v18 = vadd.f32 1.0, %v2605_v17 }
 0xbf7   :  { %2606 = vrcp.f32 %v842_v16 }
 0xbf8   :  { %2608 = vrcp.f32 %v956_v18 }
 0xc04   :  { %v2607_v19 = vpop.eup %2606 }
 0xc05   :  { %v2609_v26 = vpop.eup %2608  ;;  %v846_v29 = vmul.f32 %v2607_v19, %v3000_v42 }
 0xc06   :  { %v960_v32 = vmul.f32 %v2609_v26, %v3004_v45 }
 0xc60   :  { %v849_v23 = vpop.permute.xlu0 %848 }
 0xc61   :  { %v851_v25 = vmul.f32 %v2607_v19, %v849_v23 }
 0xc63   :  { %853 = vrot.lane.b32.xlu0 %v851_v25, %s2795_s21 }
 0xc66   :  { %v963_v27 = vpop.permute.xlu1 %962 }
 0xc67   :  { %v965_v28 = vmul.f32 %v2609_v26, %v963_v27 }
 0xc69   :  { %967 = vrot.lane.b32.xlu1 %v965_v28, %s2795_s21 }
 0xcd5   :  { %v854_v30 = vpop.permute.xlu0 %853 }
 0xcd6   :  { %v3038_v31 = vadd.f32 %v854_v30, %v846_v29 }
 0xcd8   :  { %2610 = vtanh.f32 %v3038_v31 }
 0xcdb   :  { %v968_v34 = vpop.permute.xlu1 %967 }
 0xcdc   :  { %v3042_v35 = vadd.f32 %v968_v34, %v960_v32 }
 0xcde   :  { %2612 = vtanh.f32 %v3042_v35 }
 0xce5   :  { %v2611_v36 = vpop.eup %2610 }
 0xce6   :  { %859 = vrot.lane.b32.xlu0 %v2611_v36, %s2786_s27 }
 0xceb   :  { %v2613_v37 = vpop.eup %2612 }
 0xcec   :  { %973 = vrot.lane.b32.xlu1 %v2613_v37, %s2786_s27 }
 0xd58   :  { %v860_v38 = vpop.permute.xlu0 %859 }
 0xd59   :  { %v862_v39 = vmul.f32 %v2607_v19, %v860_v38 }
 0xd5b   :  { %v863_v40 = vpack.c.bf16 %v862_v39, %v862_v39 }
 0xd5d   :  { %865 = vrot.lane.b32.xlu0 %v863_v40, %s2795_s21 }
 0xd5e   :  { %v974_v41 = vpop.permute.xlu1 %973 }
 0xd5f   :  { %v976_v42 = vmul.f32 %v2609_v26, %v974_v41 }
 0xd61   :  { %v977_v43 = vpack.c.bf16 %v976_v42, %v976_v42 }
 0xd63   :  { %979 = vrot.lane.b32.xlu1 %v977_v43, %s2795_s21  ;;  %v1283_v43 = vld [vmem:[#allocation3 + $0x30] sm:$0xff] }
 0xdcf   :  { %v866_v44 = vpop.permute.xlu0 %865 }
 0xdd0   :  { %2376 = vmatmul.mubr.msk.bf16.vlgmr.msra.gmra.mxu0 %vm99_vm1, %v866_v44 }
 0xdd1   :  { %2388 = vmatpush3.bf16.msra.mxu0 %v2885_v22  ;;  %2391 = vmatprep.mubr.msk.bf16.mxu0 %vm2793_vm0, %v2792_v0 }
 0xdd2   :  { %2389 = vmatprep.subr.bf16.mxu0 %v2792_v0 }
 0xdd5   :  { %2390 = vmatpush3.bf16.msra.mxu0 %v2892_v24  ;;  %v980_v45 = vpop.permute.xlu1 %979 }
 0xdd6   :  { %2403 = vmatprep.subr.bf16.mxu0 %v2792_v0 }
 0xdd8   :  { %2392 = vmatmul.mubr.msk.bf16.vlgmr.msra.gmra.mxu0 %vm99_vm1, %v980_v45 }
 0xdd9   :  { %2404 = vmatpush3.bf16.msra.mxu0 %v2858_v1  ;;  %2407 = vmatprep.mubr.msk.bf16.mxu0 %vm2793_vm0, %v2792_v0 }
 0xdda   :  { %2405 = vmatprep.subr.bf16.mxu0 %v2792_v0 }
 0xddd   :  { %2406 = vmatpush3.bf16.msra.mxu0 %v2864_v2 }
 0xdde   :  { %2419 = vmatprep.subr.bf16.mxu0 %v2792_v0 }
 0xde0   :  { %2408 = vmatmul.mubr.msk.bf16.vlgmr.msra.gmra.mxu0 %vm99_vm1, %v980_v45 }
 0xde1   :  { %2420 = vmatpush3.bf16.msra.mxu0 %v2876_v20  ;;  %2423 = vmatprep.mubr.msk.bf16.mxu0 %vm2793_vm0, %v2792_v0 }
 0xde2   :  { %2421 = vmatprep.subr.bf16.mxu0 %v2792_v0 }
 0xde5   :  { %2422 = vmatpush3.bf16.msra.mxu0 %v2879_v21 }
 0xde6   :  { %2435 = vmatprep.subr.bf16.mxu0 %v2792_v0 }
 0xe90   :  { %v904_v46 = vpop.f32.mrf.mxu0 }
 0xe92   :  { %v2377_v47 = vpop.f32.mrf.mxu0 }
 0xe94   :  { %v907_v48 = vpop.f32.mrf.mxu0 }
 0xe96   :  { %v2378_v49 = vpop.f32.mrf.mxu0 }
 0xe98   :  { %v1018_v50 = vpop.f32.mrf.mxu0 }
 0xe99   :  { %v1019_v51 = vadd.f32 %v1018_v50, %v904_v46 }
 0xe9a   :  { %v2393_v52 = vpop.f32.mrf.mxu0 }
 0xe9b   :  { %v1024_v53 = vadd.f32 %v2917_v33, %v1019_v51 }
 0xe9c   :  { %v1021_v54 = vpop.f32.mrf.mxu0 }
 0xe9d   :  { %2614 = vtanh.f32 %v1024_v53  ;;  %v2150_v3 = vmul.f32 -1.442695, %v1024_v53 }
 0xe9e   :  { %v2394_v55 = vpop.f32.mrf.mxu0 }
 0xea0   :  { %v1132_v57 = vpop.f32.mrf.mxu0 }
 0xea1   :  { %v1138_v58 = vadd.f32 %v1132_v57, %v1097_v56 }
 0xea2   :  { %v2409_v59 = vpop.f32.mrf.mxu0 }
 0xea3   :  { %2616 = vtanh.f32 %v1138_v58  ;;  %v2153_v4 = vmul.f32 -1.442695, %v1138_v58 }
 0xea4   :  { %v1135_v60 = vpop.f32.mrf.mxu0  ;;  %2618 = vpow2.f32 %v2150_v3 }
 0xea5   :  { %2620 = vpow2.f32 %v2153_v4 }
 0xea6   :  { %v2410_v61 = vpop.f32.mrf.mxu0 }
 0xeaa   :  { %v2615_v62 = vpop.eup %2614 }
 0xeab   :  { %1034 = vrot.lane.b32.xlu0 %v2615_v62, %s2786_s27 }
 0xeb0   :  { %v2617_v63 = vpop.eup %2616 }
 0xeb1   :  { %1148 = vrot.lane.b32.xlu1 %v2617_v63, %s2786_s27  ;;  %v2619_v5 = vpop.eup %2618 }
 0xeb2   :  { %v1028_v6 = vadd.f32 1.0, %v2619_v5  ;;  %v2621_v7 = vpop.eup %2620 }
 0xeb3   :  { %v1142_v8 = vadd.f32 1.0, %v2621_v7 }
 0xeb4   :  { %2622 = vrcp.f32 %v1028_v6 }
 0xeb5   :  { %2624 = vrcp.f32 %v1142_v8 }
 0xec1   :  { %v2623_v9 = vpop.eup %2622 }
 0xec2   :  { %v2625_v12 = vpop.eup %2624  ;;  %v1032_v15 = vmul.f32 %v2623_v9, %v3038_v31 }
 0xec3   :  { %v1146_v18 = vmul.f32 %v2625_v12, %v3042_v35 }
 0xf1d   :  { %v1035_v10 = vpop.permute.xlu0 %1034 }
 0xf1e   :  { %v1037_v11 = vmul.f32 %v2623_v9, %v1035_v10 }
 0xf20   :  { %1039 = vrot.lane.b32.xlu0 %v1037_v11, %s2795_s21 }
 0xf23   :  { %v1149_v13 = vpop.permute.xlu1 %1148 }
 0xf24   :  { %v1151_v14 = vmul.f32 %v2625_v12, %v1149_v13 }
 0xf26   :  { %1153 = vrot.lane.b32.xlu1 %v1151_v14, %s2795_s21 }
 0xf92   :  { %v1040_v16 = vpop.permute.xlu0 %1039 }
 0xf93   :  { %v3076_v17 = vadd.f32 %v1040_v16, %v1032_v15 }
 0xf95   :  { %2626 = vtanh.f32 %v3076_v17 }
 0xf98   :  { %v1154_v19 = vpop.permute.xlu1 %1153 }
 0xf99   :  { %v3080_v23 = vadd.f32 %v1154_v19, %v1146_v18  ;;  %v3156_v18 = vld [vmem:[#allocation7] sm:$0xff]  }
 0xf9b   :  { %2628 = vtanh.f32 %v3080_v23 }
 0xfa2   :  { %v2627_v25 = vpop.eup %2626 }
 0xfa3   :  { %1045 = vrot.lane.b32.xlu0 %v2627_v25, %s2786_s27 }
 0xfa8   :  { %v2629_v26 = vpop.eup %2628 }
 0xfa9   :  { %1159 = vrot.lane.b32.xlu1 %v2629_v26, %s2786_s27 }
0x1015   :  { %v1046_v27 = vpop.permute.xlu0 %1045 }
0x1016   :  { %v1048_v28 = vmul.f32 %v2623_v9, %v1046_v27 }
0x1018   :  { %v1049_v29 = vpack.c.bf16 %v1048_v28, %v1048_v28 }
0x101a   :  { %1051 = vrot.lane.b32.xlu0 %v1049_v29, %s2795_s21 }
0x101b   :  { %v1160_v30 = vpop.permute.xlu1 %1159 }
0x101c   :  { %v1162_v31 = vmul.f32 %v2625_v12, %v1160_v30 }
0x101e   :  { %v1163_v32 = vpack.c.bf16 %v1162_v31, %v1162_v31 }
0x1020   :  { %1165 = vrot.lane.b32.xlu1 %v1163_v32, %s2795_s21 }
0x108c   :  { %v1052_v34 = vpop.permute.xlu0 %1051 }
0x108d   :  { %2400 = vmatmul.mubr.msk.bf16.vlgmr.msra.gmra.mxu1 %vm99_vm1, %v1052_v34  ;;  %v1469_v34 = vld [vmem:[#allocation3 + $0x38] sm:$0xff] }
0x108e   :  { %2412 = vmatpush3.bf16.msra.mxu1 %v2885_v22  ;;  %2415 = vmatprep.mubr.msk.bf16.mxu1 %vm2793_vm0, %v2792_v0 }
0x108f   :  { %2413 = vmatprep.subr.bf16.mxu1 %v2792_v0 }
0x1092   :  { %2414 = vmatpush3.bf16.msra.mxu1 %v2892_v24  ;;  %v1166_v35 = vpop.permute.xlu1 %1165 }
0x1093   :  { %2427 = vmatprep.subr.bf16.mxu1 %v2792_v0 }
0x1095   :  { %2416 = vmatmul.mubr.msk.bf16.vlgmr.msra.gmra.mxu1 %vm99_vm1, %v1166_v35 }
0x1096   :  { %2428 = vmatpush3.bf16.msra.mxu1 %v2858_v1  ;;  %2431 = vmatprep.mubr.msk.bf16.mxu1 %vm2793_vm0, %v2792_v0 }
0x1097   :  { %2429 = vmatprep.subr.bf16.mxu1 %v2792_v0 }
0x109a   :  { %2430 = vmatpush3.bf16.msra.mxu1 %v2864_v2 }
0x109b   :  { %2443 = vmatprep.subr.bf16.mxu1 %v2792_v0 }
0x109d   :  { %2432 = vmatmul.mubr.msk.bf16.vlgmr.msra.gmra.mxu1 %vm99_vm1, %v1166_v35 }
0x109e   :  { %2444 = vmatpush3.bf16.msra.mxu1 %v2876_v20  ;;  %2447 = vmatprep.mubr.msk.bf16.mxu1 %vm2793_vm0, %v2792_v0 }
0x109f   :  { %2445 = vmatprep.subr.bf16.mxu1 %v2792_v0 }
0x10a2   :  { %2446 = vmatpush3.bf16.msra.mxu1 %v2879_v21 }
0x10a3   :  { %2459 = vmatprep.subr.bf16.mxu1 %v2792_v0 }
0x114d   :  { %v1090_v1 = vpop.f32.mrf.mxu1 }
0x114f   :  { %v2401_v36 = vpop.f32.mrf.mxu1 }
0x1151   :  { %v1093_v37 = vpop.f32.mrf.mxu1 }
0x1153   :  { %v2402_v38 = vpop.f32.mrf.mxu1 }
0x1155   :  { %v1204_v2 = vpop.f32.mrf.mxu1 }
0x1156   :  { %v1205_v39 = vadd.f32 %v1204_v2, %v1090_v1 }
0x1157   :  { %v2417_v40 = vpop.f32.mrf.mxu1 }
0x1158   :  { %v1210_v41 = vadd.f32 %v2917_v33, %v1205_v39 }
0x1159   :  { %v1207_v42 = vpop.f32.mrf.mxu1 }
0x115a   :  { %2630 = vtanh.f32 %v1210_v41  ;;  %v2155_v50 = vmul.f32 -1.442695, %v1210_v41 }
0x115b   :  { %v2418_v20 = vpop.f32.mrf.mxu1 }
0x115d   :  { %v1318_v44 = vpop.f32.mrf.mxu1 }
0x115e   :  { %v1324_v45 = vadd.f32 %v1318_v44, %v1283_v43 }
0x115f   :  { %v2433_v46 = vpop.f32.mrf.mxu1 }
0x1160   :  { %2632 = vtanh.f32 %v1324_v45  ;;  %v2158_v51 = vmul.f32 -1.442695, %v1324_v45 }
0x1161   :  { %v1321_v21 = vpop.f32.mrf.mxu1  ;;  %2634 = vpow2.f32 %v2155_v50 }
0x1162   :  { %2636 = vpow2.f32 %v2158_v51 }
0x1163   :  { %v2434_v47 = vpop.f32.mrf.mxu1 }
0x1167   :  { %v2631_v48 = vpop.eup %2630 }
0x1168   :  { %1220 = vrot.lane.b32.xlu0 %v2631_v48, %s2786_s27 }
0x116d   :  { %v2633_v49 = vpop.eup %2632 }
0x116e   :  { %1334 = vrot.lane.b32.xlu1 %v2633_v49, %s2786_s27  ;;  %v2635_v52 = vpop.eup %2634 }
0x116f   :  { %v1214_v53 = vadd.f32 1.0, %v2635_v52  ;;  %v2637_v54 = vpop.eup %2636 }
0x1170   :  { %v1328_v55 = vadd.f32 1.0, %v2637_v54 }
0x1171   :  { %2638 = vrcp.f32 %v1214_v53 }
0x1172   :  { %2640 = vrcp.f32 %v1328_v55 }
0x117e   :  { %v2639_v56 = vpop.eup %2638 }
0x117f   :  { %v2641_v59 = vpop.eup %2640  ;;  %v1218_v62 = vmul.f32 %v2639_v56, %v3076_v17  ;;  %v3136_v17 = vld [vmem:[%s3301_s1 + $0x8] sm:$0xff]  }
0x1180   :  { %v1332_v4 = vmul.f32 %v2641_v59, %v3080_v23 }
0x11da   :  { %v1221_v57 = vpop.permute.xlu0 %1220 }
0x11db   :  { %v1223_v58 = vmul.f32 %v2639_v56, %v1221_v57 }
0x11dd   :  { %1225 = vrot.lane.b32.xlu0 %v1223_v58, %s2795_s21 }
0x11e0   :  { %v1335_v60 = vpop.permute.xlu1 %1334 }
0x11e1   :  { %v1337_v61 = vmul.f32 %v2641_v59, %v1335_v60 }
0x11e3   :  { %1339 = vrot.lane.b32.xlu1 %v1337_v61, %s2795_s21 }
0x124f   :  { %v1226_v63 = vpop.permute.xlu0 %1225 }
0x1250   :  { %v3114_v3 = vadd.f32 %v1226_v63, %v1218_v62 }
0x1252   :  { %2642 = vtanh.f32 %v3114_v3 }
0x1255   :  { %v1340_v5 = vpop.permute.xlu1 %1339 }
0x1256   :  { %v3118_v6 = vadd.f32 %v1340_v5, %v1332_v4  ;;  %v3184_v4 = vld [vmem:[#allocation5] sm:$0xff]  }
0x1258   :  { %2644 = vtanh.f32 %v3118_v6 }
0x125f   :  { %v2643_v7 = vpop.eup %2642 }
0x1260   :  { %1231 = vrot.lane.b32.xlu0 %v2643_v7, %s2786_s27 }
0x1265   :  { %v2645_v8 = vpop.eup %2644 }
0x1266   :  { %1345 = vrot.lane.b32.xlu1 %v2645_v8, %s2786_s27 }
0x12d2   :  { %v1232_v9 = vpop.permute.xlu0 %1231 }
0x12d3   :  { %v1234_v10 = vmul.f32 %v2639_v56, %v1232_v9 }
0x12d5   :  { %v1235_v11 = vpack.c.bf16 %v1234_v10, %v1234_v10 }
0x12d7   :  { %1237 = vrot.lane.b32.xlu0 %v1235_v11, %s2795_s21 }
0x12d8   :  { %v1346_v12 = vpop.permute.xlu1 %1345 }
0x12d9   :  { %v1348_v13 = vmul.f32 %v2641_v59, %v1346_v12 }
0x12db   :  { %v1349_v14 = vpack.c.bf16 %v1348_v13, %v1348_v13  ;;  %v3205_v13 = vld [vmem:[%s3304_s4] ss:$0 sm:$0xff] }
0x12dd   :  { %1351 = vrot.lane.b32.xlu1 %v1349_v14, %s2795_s21 }
0x1349   :  { %v1238_v15 = vpop.permute.xlu0 %1237 }
0x134a   :  { %2424 = vmatmul.mubr.msk.bf16.vlgmr.msra.gmra.mxu0 %vm99_vm1, %v1238_v15 }
0x134b   :  { %2436 = vmatpush3.bf16.msra.mxu0 %v2885_v22  ;;  %2439 = vmatprep.mubr.msk.bf16.mxu0 %vm2793_vm0, %v2792_v0  ;;  %v3145_v22 = vld [vmem:[%s3301_s1] sm:$0xff]  }
0x134c   :  { %2437 = vmatprep.subr.bf16.mxu0 %v2792_v0 }
0x134f   :  { %2438 = vmatpush3.bf16.msra.mxu0 %v2892_v24  ;;  %v1352_v16 = vpop.permute.xlu1 %1351  ;;  %v3150_v24 = vld [vmem:[#allocation7 + $0x8] sm:$0xff]  }
0x1350   :  { %2451 = vmatprep.subr.bf16.mxu0 %v2792_v0 }
0x1352   :  { %2440 = vmatmul.mubr.msk.bf16.vlgmr.msra.gmra.mxu0 %vm99_vm1, %v1352_v16 }
0x1353   :  { %2452 = vmatpush3.bf16.msra.mxu0 %v3136_v17  ;;  %2455 = vmatprep.mubr.msk.bf16.mxu0 %vm2793_vm0, %v2792_v0 }
0x1354   :  { %2453 = vmatprep.subr.bf16.mxu0 %v2792_v0 }
0x1357   :  { %2454 = vmatpush3.bf16.msra.mxu0 %v3145_v22 }
0x1358   :  { %2467 = vmatprep.subr.bf16.mxu0 %v2792_v0 }
0x135a   :  { %2456 = vmatmul.mubr.msk.bf16.vlgmr.msra.gmra.mxu0 %vm99_vm1, %v1352_v16 }
0x135b   :  { %2468 = vmatpush3.bf16.msra.mxu0 %v3150_v24  ;;  %2471 = vmatprep.mubr.msk.bf16.mxu0 %vm2793_vm0, %v2792_v0 }
0x135c   :  { %2469 = vmatprep.subr.bf16.mxu0 %v2792_v0 }
0x135f   :  { %2470 = vmatpush3.bf16.msra.mxu0 %v3156_v18 }
0x1360   :  { %2483 = vmatprep.subr.bf16.mxu0 %v2792_v0 }
0x140a   :  { %v1276_v19 = vpop.f32.mrf.mxu0 }
0x140c   :  { %v2425_v23 = vpop.f32.mrf.mxu0 }
0x140e   :  { %v1279_v25 = vpop.f32.mrf.mxu0 }
0x1410   :  { %v2426_v26 = vpop.f32.mrf.mxu0 }
0x1412   :  { %v1390_v27 = vpop.f32.mrf.mxu0 }
0x1413   :  { %v1391_v28 = vadd.f32 %v1390_v27, %v1276_v19 }
0x1414   :  { %v2441_v29 = vpop.f32.mrf.mxu0 }
0x1415   :  { %v1396_v30 = vadd.f32 %v2917_v33, %v1391_v28 }
0x1416   :  { %v1393_v31 = vpop.f32.mrf.mxu0 }
0x1417   :  { %2646 = vtanh.f32 %v1396_v30  ;;  %v2160_v40 = vmul.f32 -1.442695, %v1396_v30 }
0x1418   :  { %v2442_v32 = vpop.f32.mrf.mxu0 }
0x141a   :  { %v1504_v35 = vpop.f32.mrf.mxu0 }
0x141b   :  { %v1510_v1 = vadd.f32 %v1504_v35, %v1469_v34 }
0x141c   :  { %v2457_v36 = vpop.f32.mrf.mxu0 }
0x141d   :  { %2648 = vtanh.f32 %v1510_v1  ;;  %v2163_v41 = vmul.f32 -1.442695, %v1510_v1 }
0x141e   :  { %v1507_v37 = vpop.f32.mrf.mxu0  ;;  %2650 = vpow2.f32 %v2160_v40 }
0x141f   :  { %2652 = vpow2.f32 %v2163_v41 }
0x1420   :  { %v2458_v38 = vpop.f32.mrf.mxu0 }
0x1424   :  { %v2647_v2 = vpop.eup %2646 }
0x1425   :  { %1406 = vrot.lane.b32.xlu0 %v2647_v2, %s2786_s27 }
0x142a   :  { %v2649_v39 = vpop.eup %2648 }
0x142b   :  { %1520 = vrot.lane.b32.xlu1 %v2649_v39, %s2786_s27  ;;  %v2651_v33 = vpop.eup %2650 }
0x142c   :  { %v1400_v42 = vadd.f32 1.0, %v2651_v33  ;;  %v2653_v20 = vpop.eup %2652 }
0x142d   :  { %v1514_v43 = vadd.f32 1.0, %v2653_v20 }
0x142e   :  { %2654 = vrcp.f32 %v1400_v42 }
0x142f   :  { %2656 = vrcp.f32 %v1514_v43 }
0x143b   :  { %v2655_v44 = vpop.eup %2654 }
0x143c   :  { %v2657_v21 = vpop.eup %2656  ;;  %v1404_v49 = vmul.f32 %v2655_v44, %v3114_v3  ;;  %v3178_v3 = vld [vmem:[#allocation5 + $0x8] sm:$0xff]  }
0x143d   :  { %v1518_v52 = vmul.f32 %v2657_v21, %v3118_v6 }
0x1497   :  { %v1407_v45 = vpop.permute.xlu0 %1406 }
0x1498   :  { %v1409_v46 = vmul.f32 %v2655_v44, %v1407_v45 }
0x149a   :  { %1411 = vrot.lane.b32.xlu0 %v1409_v46, %s2795_s21 }
0x149d   :  { %v1521_v47 = vpop.permute.xlu1 %1520 }
0x149e   :  { %v1523_v48 = vmul.f32 %v2657_v21, %v1521_v47 }
0x14a0   :  { %1525 = vrot.lane.b32.xlu1 %v1523_v48, %s2795_s21 }
0x150c   :  { %v1412_v50 = vpop.permute.xlu0 %1411 }
0x150d   :  { %v3166_v51 = vadd.f32 %v1412_v50, %v1404_v49 }
0x150f   :  { %2658 = vtanh.f32 %v3166_v51 }
0x1512   :  { %v1526_v53 = vpop.permute.xlu1 %1525 }
0x1513   :  { %v3170_v54 = vadd.f32 %v1526_v53, %v1518_v52 }
0x1515   :  { %2660 = vtanh.f32 %v3170_v54 }
0x151c   :  { %v2659_v55 = vpop.eup %2658 }
0x151d   :  { %1417 = vrot.lane.b32.xlu0 %v2659_v55, %s2786_s27 }
0x1522   :  { %v2661_v56 = vpop.eup %2660 }
0x1523   :  { %1531 = vrot.lane.b32.xlu1 %v2661_v56, %s2786_s27 }
0x158f   :  { %v1418_v57 = vpop.permute.xlu0 %1417 }
0x1590   :  { %v1420_v58 = vmul.f32 %v2655_v44, %v1418_v57 }
0x1592   :  { %v1421_v59 = vpack.c.bf16 %v1420_v58, %v1420_v58 }
0x1594   :  { %1423 = vrot.lane.b32.xlu0 %v1421_v59, %s2795_s21 }
0x1595   :  { %v1532_v60 = vpop.permute.xlu1 %1531 }
0x1596   :  { %v1534_v61 = vmul.f32 %v2657_v21, %v1532_v60 }
0x1598   :  { %v1535_v62 = vpack.c.bf16 %v1534_v61, %v1534_v61 }
0x159a   :  { %1537 = vrot.lane.b32.xlu1 %v1535_v62, %s2795_s21  ;;  %v1852_v62 = vld [vmem:[#allocation3 + $0x48] sm:$0xff] }
0x1606   :  { %v1424_v63 = vpop.permute.xlu0 %1423 }
0x1607   :  { %2448 = vmatmul.mubr.msk.bf16.vlgmr.msra.gmra.mxu1 %vm99_vm1, %v1424_v63 }
0x1608   :  { %2460 = vmatpush3.bf16.msra.mxu1 %v3178_v3  ;;  %2463 = vmatprep.mubr.msk.bf16.mxu1 %vm2793_vm0, %v2792_v0 }
0x1609   :  { %2461 = vmatprep.subr.bf16.mxu1 %v2792_v0 }
0x160c   :  { %2462 = vmatpush3.bf16.msra.mxu1 %v3184_v4  ;;  %v1538_v5 = vpop.permute.xlu1 %1537 }
0x160d   :  { %2475 = vmatprep.subr.bf16.mxu1 %v2792_v0 }
0x160f   :  { %2464 = vmatmul.mubr.msk.bf16.vlgmr.msra.gmra.mxu1 %vm99_vm1, %v1538_v5 }
0x1610   :  { %2476 = vmatpush3.bf16.msra.mxu1 %v3136_v17  ;;  %2479 = vmatprep.mubr.msk.bf16.mxu1 %vm2793_vm0, %v2792_v0 }
0x1611   :  { %2477 = vmatprep.subr.bf16.mxu1 %v2792_v0 }
0x1614   :  { %2478 = vmatpush3.bf16.msra.mxu1 %v3145_v22 }
0x1615   :  { %2491 = vmatprep.subr.bf16.mxu1 %v2792_v0 }
0x1617   :  { %2480 = vmatmul.mubr.msk.bf16.vlgmr.msra.gmra.mxu1 %vm99_vm1, %v1538_v5 }
0x1618   :  { %2492 = vmatpush3.bf16.msra.mxu1 %v3150_v24  ;;  %2495 = vmatprep.mubr.msk.bf16.mxu1 %vm2793_vm0, %v2792_v0  ;;  %v1660_v24 = vld [vmem:[#allocation3 + $0x40] sm:$0xff] }
0x1619   :  { %2493 = vmatprep.subr.bf16.mxu1 %v2792_v0 }
0x161c   :  { %2494 = vmatpush3.bf16.msra.mxu1 %v3156_v18 }
0x161d   :  { %2507 = vmatprep.subr.bf16.mxu1 %v2792_v0 }
0x16c7   :  { %v1462_v6 = vpop.f32.mrf.mxu1 }
0x16c9   :  { %v2449_v7 = vpop.f32.mrf.mxu1 }
0x16cb   :  { %v1465_v8 = vpop.f32.mrf.mxu1 }
0x16cd   :  { %v2450_v9 = vpop.f32.mrf.mxu1 }
0x16cf   :  { %v1576_v10 = vpop.f32.mrf.mxu1 }
0x16d0   :  { %v1577_v11 = vadd.f32 %v1576_v10, %v1462_v6 }
0x16d1   :  { %v2465_v12 = vpop.f32.mrf.mxu1 }
0x16d2   :  { %v1582_v14 = vadd.f32 %v3205_v13, %v1577_v11 }
0x16d3   :  { %v1579_v15 = vpop.f32.mrf.mxu1 }
0x16d4   :  { %2662 = vtanh.f32 %v1582_v14  ;;  %v2165_v29 = vmul.f32 -1.442695, %v1582_v14 }
0x16d5   :  { %v2466_v16 = vpop.f32.mrf.mxu1 }
0x16d7   :  { %v1695_v18 = vpop.f32.mrf.mxu1 }
0x16d8   :  { %v1701_v19 = vadd.f32 %v1695_v18, %v1660_v24 }
0x16d9   :  { %v2481_v23 = vpop.f32.mrf.mxu1 }
0x16da   :  { %2664 = vtanh.f32 %v1701_v19  ;;  %v2168_v30 = vmul.f32 -1.442695, %v1701_v19 }
0x16db   :  { %v1698_v25 = vpop.f32.mrf.mxu1  ;;  %2666 = vpow2.f32 %v2165_v29 }
0x16dc   :  { %2668 = vpow2.f32 %v2168_v30 }
0x16dd   :  { %v2482_v26 = vpop.f32.mrf.mxu1 }
0x16e1   :  { %v2663_v27 = vpop.eup %2662 }
0x16e2   :  { %1592 = vrot.lane.b32.xlu0 %v2663_v27, %s2786_s27 }
0x16e7   :  { %v2665_v28 = vpop.eup %2664 }
0x16e8   :  { %1711 = vrot.lane.b32.xlu1 %v2665_v28, %s2786_s27  ;;  %v2667_v31 = vpop.eup %2666 }
0x16e9   :  { %v1586_v32 = vadd.f32 1.0, %v2667_v31  ;;  %v2669_v34 = vpop.eup %2668 }
0x16ea   :  { %v1705_v35 = vadd.f32 1.0, %v2669_v34 }
0x16eb   :  { %2670 = vrcp.f32 %v1586_v32 }
0x16ec   :  { %2672 = vrcp.f32 %v1705_v35 }
0x16f8   :  { %v2671_v1 = vpop.eup %2670 }
0x16f9   :  { %v2673_v38 = vpop.eup %2672  ;;  %v1590_v40 = vmul.f32 %v2671_v1, %v3166_v51 }
0x16fa   :  { %v1709_v42 = vmul.f32 %v2673_v38, %v3170_v54 }
0x1754   :  { %v1593_v36 = vpop.permute.xlu0 %1592 }
0x1755   :  { %v1595_v37 = vmul.f32 %v2671_v1, %v1593_v36 }
0x1757   :  { %1597 = vrot.lane.b32.xlu0 %v1595_v37, %s2795_s21 }
0x175a   :  { %v1712_v2 = vpop.permute.xlu1 %1711 }
0x175b   :  { %v1714_v39 = vmul.f32 %v2673_v38, %v1712_v2 }
0x175d   :  { %1716 = vrot.lane.b32.xlu1 %v1714_v39, %s2795_s21 }
0x17c9   :  { %v1598_v41 = vpop.permute.xlu0 %1597 }
0x17ca   :  { %v3213_v33 = vadd.f32 %v1598_v41, %v1590_v40 }
0x17cc   :  { %2674 = vtanh.f32 %v3213_v33 }
0x17cf   :  { %v1717_v20 = vpop.permute.xlu1 %1716 }
0x17d0   :  { %v3217_v43 = vadd.f32 %v1717_v20, %v1709_v42 }
0x17d2   :  { %2676 = vtanh.f32 %v3217_v43 }
0x17d9   :  { %v2675_v44 = vpop.eup %2674 }
0x17da   :  { %1603 = vrot.lane.b32.xlu0 %v2675_v44, %s2786_s27 }
0x17df   :  { %v2677_v45 = vpop.eup %2676 }
0x17e0   :  { %1722 = vrot.lane.b32.xlu1 %v2677_v45, %s2786_s27 }
0x184c   :  { %v1604_v46 = vpop.permute.xlu0 %1603 }
0x184d   :  { %v3222_v21 = vmul.f32 %v2671_v1, %v1604_v46 }
0x184f   :  { %v1612_v47 = vpack.c.bf16 %v3222_v21, %v3222_v21 }
0x1851   :  { %1614 = vrot.lane.b32.xlu0 %v1612_v47, %s2795_s21 }
0x1852   :  { %v1723_v48 = vpop.permute.xlu1 %1722 }
0x1853   :  { %v1725_v49 = vmul.f32 %v2673_v38, %v1723_v48 }
0x1855   :  { %v1726_v50 = vpack.c.bf16 %v1725_v49, %v1725_v49 }
0x1857   :  { %1728 = vrot.lane.b32.xlu1 %v1726_v50, %s2795_s21 }
0x18c3   :  { %v1615_v51 = vpop.permute.xlu0 %1614 }
0x18c4   :  { %2472 = vmatmul.mubr.msk.bf16.vlgmr.msra.gmra.mxu0 %vm99_vm1, %v1615_v51 }
0x18c5   :  { %2484 = vmatpush3.bf16.msra.mxu0 %v3178_v3  ;;  %2487 = vmatprep.mubr.msk.bf16.mxu0 %vm2793_vm0, %v2792_v0 }
0x18c6   :  { %2485 = vmatprep.subr.bf16.mxu0 %v2792_v0 }
0x18c9   :  { %2486 = vmatpush3.bf16.msra.mxu0 %v3184_v4  ;;  %v1729_v52 = vpop.permute.xlu1 %1728 }
0x18ca   :  { %2499 = vmatprep.subr.bf16.mxu0 %v2792_v0 }
0x18cc   :  { %2488 = vmatmul.mubr.msk.bf16.vlgmr.msra.gmra.mxu0 %vm99_vm1, %v1729_v52 }
0x18cd   :  { %2500 = vmatpush3.bf16.msra.mxu0 %v3136_v17  ;;  %2503 = vmatprep.mubr.msk.bf16.mxu0 %vm2793_vm0, %v2792_v0 }
0x18ce   :  { %2501 = vmatprep.subr.bf16.mxu0 %v2792_v0 }
0x18d1   :  { %2502 = vmatpush3.bf16.msra.mxu0 %v3145_v22 }
0x18d4   :  { %2504 = vmatmul.mubr.msk.bf16.vlgmr.msra.gmra.mxu0 %vm99_vm1, %v1729_v52 }
0x1984   :  { %v1653_v53 = vpop.f32.mrf.mxu0 }
0x1986   :  { %v2473_v54 = vpop.f32.mrf.mxu0 }
0x1988   :  { %v1656_v55 = vpop.f32.mrf.mxu0 }
0x198a   :  { %v2474_v56 = vpop.f32.mrf.mxu0 }
0x198c   :  { %v1767_v57 = vpop.f32.mrf.mxu0 }
0x198d   :  { %v1768_v58 = vadd.f32 %v1767_v57, %v1653_v53 }
0x198e   :  { %v2489_v59 = vpop.f32.mrf.mxu0 }
0x198f   :  { %v1773_v60 = vadd.f32 %v3205_v13, %v1768_v58  ;;  %v2540_v58 = vld [vmem:[%s3305_s5 + $0x8] sm:$0xff]  }
0x1990   :  { %v1770_v61 = vpop.f32.mrf.mxu0  ;;  %2515 = vmatprep.subr.bf16.mxu0 %v2540_v58 }
0x1991   :  { %2678 = vtanh.f32 %v1773_v60  ;;  %v2170_v10 = vmul.f32 -1.442695, %v1773_v60  ;;  %2516 = vmatpush3.bf16.msra.mxu0 %v2540_v58 }
0x1992   :  { %v2490_v17 = vpop.f32.mrf.mxu0 }
0x1994   :  { %v1887_v63 = vpop.f32.mrf.mxu0 }
0x1995   :  { %v1893_v5 = vadd.f32 %v1887_v63, %v1852_v62 }
0x1996   :  { %v2505_v6 = vpop.f32.mrf.mxu0 }
0x1997   :  { %2680 = vtanh.f32 %v1893_v5  ;;  %v2173_v11 = vmul.f32 -1.442695, %v1893_v5 }
0x1998   :  { %v1890_v22 = vpop.f32.mrf.mxu0  ;;  %2682 = vpow2.f32 %v2170_v10 }
0x1999   :  { %2684 = vpow2.f32 %v2173_v11 }
0x199a   :  { %v2506_v7 = vpop.f32.mrf.mxu0 }
0x199e   :  { %v2679_v8 = vpop.eup %2678 }
0x199f   :  { %1783 = vrot.lane.b32.xlu0 %v2679_v8, %s2786_s27  ;;  %v2176_v8 = vld [vmem:[%s3306_s6] ss:$0 sm:$0xff] }
0x19a4   :  { %v2681_v9 = vpop.eup %2680 }
0x19a5   :  { %1903 = vrot.lane.b32.xlu1 %v2681_v9, %s2786_s27  ;;  %v2683_v12 = vpop.eup %2682 }
0x19a6   :  { %v1777_v14 = vadd.f32 1.0, %v2683_v12  ;;  %v2685_v15 = vpop.eup %2684 }
0x19a7   :  { %v1897_v16 = vadd.f32 1.0, %v2685_v15 }
0x19a8   :  { %2686 = vrcp.f32 %v1777_v14 }
0x19a9   :  { %2688 = vrcp.f32 %v1897_v16 }
0x19b5   :  { %v2687_v24 = vpop.eup %2686 }
0x19b6   :  { %v2689_v23 = vpop.eup %2688  ;;  %v1781_v27 = vmul.f32 %v2687_v24, %v3213_v33 }
0x19b7   :  { %v1901_v30 = vmul.f32 %v2689_v23, %v3217_v43 }
0x1a11   :  { %v1784_v18 = vpop.permute.xlu0 %1783 }
0x1a12   :  { %v1786_v19 = vmul.f32 %v2687_v24, %v1784_v18 }
0x1a14   :  { %1788 = vrot.lane.b32.xlu0 %v1786_v19, %s2795_s21 }
0x1a17   :  { %v1904_v25 = vpop.permute.xlu1 %1903 }
0x1a18   :  { %v1906_v26 = vmul.f32 %v2689_v23, %v1904_v25 }
0x1a1a   :  { %1908 = vrot.lane.b32.xlu1 %v1906_v26, %s2795_s21 }
0x1a86   :  { %v1789_v28 = vpop.permute.xlu0 %1788 }
0x1a87   :  { %v1791_v29 = vadd.f32 %v1789_v28, %v1781_v27 }
0x1a89   :  { %2690 = vtanh.f32 %v1791_v29 }
0x1a8c   :  { %v1909_v31 = vpop.permute.xlu1 %1908 }
0x1a8d   :  { %v1911_v32 = vadd.f32 %v1909_v31, %v1901_v30 }
0x1a8f   :  { %2692 = vtanh.f32 %v1911_v32 }
0x1a96   :  { %v2691_v34 = vpop.eup %2690 }
0x1a97   :  { %1794 = vrot.lane.b32.xlu0 %v2691_v34, %s2786_s27 }
0x1a9c   :  { %v2693_v35 = vpop.eup %2692 }
0x1a9d   :  { %1914 = vrot.lane.b32.xlu1 %v2693_v35, %s2786_s27 }
0x1b09   :  { %v1795_v1 = vpop.permute.xlu0 %1794 }
0x1b0a   :  { %v1797_v36 = vmul.f32 %v2687_v24, %v1795_v1 }
0x1b0c   :  { %v1804_v37 = vpack.c.bf16 %v1797_v36, %v1797_v36 }
0x1b0e   :  { %1806 = vrot.lane.b32.xlu0 %v1804_v37, %s2795_s21 }
0x1b0f   :  { %v1915_v38 = vpop.permute.xlu1 %1914 }
0x1b10   :  { %v1917_v2 = vmul.f32 %v2689_v23, %v1915_v38 }
0x1b12   :  { %v1918_v39 = vpack.c.bf16 %v1917_v2, %v1917_v2 }
0x1b14   :  { %1920 = vrot.lane.b32.xlu1 %v1918_v39, %s2795_s21 }
0x1b80   :  { %v1807_v40 = vpop.permute.xlu0 %1806 }
0x1b81   :  { %2496 = vmatmul.mubr.msk.bf16.vlgmr.msra.gmra.mxu1 %vm99_vm1, %v1807_v40 }
0x1b82   :  { %2508 = vmatpush3.bf16.msra.mxu1 %v3178_v3  ;;  %2511 = vmatprep.mubr.msk.bf16.mxu1 %vm2793_vm0, %v2792_v0 }
0x1b83   :  { %2509 = vmatprep.subr.bf16.mxu1 %v2792_v0 }
0x1b86   :  { %2510 = vmatpush3.bf16.msra.mxu1 %v3184_v4  ;;  %v1921_v41 = vpop.permute.xlu1 %1920 }
0x1b89   :  { %2512 = vmatmul.mubr.msk.bf16.vlgmr.msra.gmra.mxu1 %vm99_vm1, %v1921_v41 }
0x1c41   :  { %v1845_v33 = vpop.f32.mrf.mxu1 }
0x1c43   :  { %v2497_v42 = vpop.f32.mrf.mxu1 }
0x1c45   :  { %v1848_v20 = vpop.f32.mrf.mxu1 }
0x1c47   :  { %v2498_v43 = vpop.f32.mrf.mxu1 }
0x1c49   :  { %v1959_v44 = vpop.f32.mrf.mxu1 }
0x1c4a   :  { %v1960_v45 = vadd.f32 %v1959_v44, %v1845_v33 }
0x1c4b   :  { %v2513_v46 = vpop.f32.mrf.mxu1 }
0x1c4c   :  { %v1965_v47 = vadd.f32 %v3205_v13, %v1960_v45 }
0x1c4d   :  { %v1962_v3 = vpop.f32.mrf.mxu1 }
0x1c4e   :  { %2694 = vtanh.f32 %v1965_v47  ;;  %v2175_v0 = vmul.f32 -1.442695, %v1965_v47 }
0x1c4f   :  { %v2514_v48 = vpop.f32.mrf.mxu1 }
0x1c50   :  { %2696 = vpow2.f32 %v2175_v0 }
0x1c5b   :  { %v2695_v49 = vpop.eup %2694 }
0x1c5c   :  { %1975 = vrot.lane.b32.xlu0 %v2695_v49, %s2786_s27 }
0x1c5d   :  { %v2697_v4 = vpop.eup %2696 }
0x1c5e   :  { %v1969_v50 = vadd.f32 1.0, %v2697_v4 }
0x1c60   :  { %2698 = vrcp.f32 %v1969_v50 }
0x1c6d   :  { %v2699_v51 = vpop.eup %2698 }
0x1c6e   :  { %v1973_v13 = vmul.f32 %v2699_v51, %v1791_v29 }
0x1cce   :  { %v1976_v52 = vpop.permute.xlu0 %1975 }
0x1ccf   :  { %v1978_v53 = vmul.f32 %v2699_v51, %v1976_v52 }
0x1cd1   :  { %1980 = vrot.lane.b32.xlu1 %v1978_v53, %s2795_s21 }
0x1cd5   :  { %1608 = vrot.lane.b32.xlu1 %v3222_v21, %s2795_s21  ;;  %v2541_v21 = vld [vmem:[%s3305_s5] sm:$0xff]  }
0x1cd6   :  { %2517 = vmatprep.subr.bf16.mxu0 %v2541_v21 }
0x1cd7   :  { %2518 = vmatpush3.bf16.msra.mxu0 %v2541_v21 }
0x1d43   :  { %v1981_v54 = vpop.permute.xlu1 %1980 }
0x1d44   :  { %v1983_v55 = vadd.f32 %v1981_v54, %v1973_v13 }
0x1d46   :  { %2700 = vtanh.f32 %v1983_v55 }
0x1d47   :  { %v1609_v56 = vpop.permute.xlu1 %1608 }
0x1d48   :  { %1611 = vst.msk [vmem:[#allocation2] sm:$0xff] %vm99_vm1, %v1609_v56 }
0x1d4f   :  { %v1996_v17 = vld [vmem:[#allocation2] sm:$0xff] }
0x1d53   :  { %v2701_v57 = vpop.eup %2700 }
0x1d54   :  { %1986 = vrot.lane.b32.xlu0 %v2701_v57, %s2786_s27 }
0x1d58   :  { %1799 = vrot.lane.b32.xlu0 %v1797_v36, %s2795_s21 }
0x1dc6   :  { %v1987_v59 = vpop.permute.xlu0 %1986 }
0x1dc7   :  { %v1989_v60 = vmul.f32 %v2699_v51, %v1987_v59 }
0x1dc9   :  { %1991 = vrot.lane.b32.xlu1 %v1989_v60, %s2795_s21 }
0x1dca   :  { %v1800_v61 = vpop.permute.xlu0 %1799 }
0x1dcb   :  { %1803 = vst.msk [vmem:[#allocation2 + $0x8] sm:$0xff] %vm99_vm1, %v1800_v61 }
0x1dd2   :  { %v1997_v62 = vld [vmem:[#allocation2 + $0x8] sm:$0xff] }
0x1dd3   :  { %v1999_v63 = vpack.c.bf16 %v1997_v62, %v1996_v17 }
0x1dd5   :  { %2519 = vmatprep.mubr.msk.bf16.mxu0 %vm99_vm1, %v1999_v63 }
0x1e3b   :  { %v1992_v5 = vpop.permute.xlu1 %1991 }
0x1e3c   :  { %1995 = vst.msk [vmem:[#allocation2 + $0x10] sm:$0xff] %vm99_vm1, %v1992_v5 }
0x1e43   :  { %v1998_v6 = vld [vmem:[#allocation2 + $0x10] sm:$0xff] }
0x1e44   :  { %v2000_v22 = vpack.c.bf16 %v1998_v6, %v1998_v6 }
0x1e46   :  { %2520 = vmatmul.mubr.msk.bf16.vlgmr.msra.gmra.mxu0 %vm99_vm1, %v2000_v22 }
0x1f06   :  { %v2521_v7 = vpop.f32.mrf.mxu0 }
0x1f07   :  { %v2073_v12 = vadd.f32 %v2521_v7, %v2176_v8 }
0x1f08   :  { %v2064_v9 = vpop.f32.mrf.mxu0 }
0x1f09   :  { %v2065_v10 = vadd.f32 %v2176_v8, %v2064_v9  ;;  %v2085_v18 = vsel %vm2078_vm2, %v2073_v12, -inf }
0x1f0a   :  { %v2522_v11 = vpop.f32.mrf.mxu0 }
0x1f0b   :  { %v2079_v14 = vsel %vm2078_vm2, %v2065_v10, -inf }
0x1f0c   :  { %v2067_v15 = vpop.f32.mrf.mxu0  ;;  %2080 = vmax.xlane.f32.xlu0 %v2079_v14 }
0x1f0d   :  { %v2068_v16 = vadd.f32 %v2176_v8, %v2067_v15 }
0x1f0f   :  { %v2082_v24 = vsel %vm2078_vm2, %v2068_v16, -inf }
0x1f10   :  { %2083 = vmax.xlane.f32.xlu1 %v2082_v24  ;;  %2086 = vmax.xlane.f32.xlu0 %v2085_v18 }
0x1f95   :  { %v2081_v19 = vpop.xlane.xlu0 %2080 }
0x1f96   :  { %v2088_v23 = vsub.f32 %v2065_v10, %v2081_v19 }
0x1f98   :  { %v2091_v25 = vmul.f32 1.442695, %v2088_v23 }
0x1f99   :  { %v2084_v26 = vpop.xlane.xlu1 %2083  ;;  %v2087_v27 = vpop.xlane.xlu0 %2086 }
0x1f9a   :  { %2702 = vpow2.f32 %v2091_v25  ;;  %v2089_v28 = vsub.f32 %v2068_v16, %v2084_v26  ;;  %v2090_v29 = vsub.f32 %v2073_v12, %v2087_v27 }
0x1f9c   :  { %v2093_v30 = vmul.f32 1.442695, %v2089_v28  ;;  %v2095_v31 = vmul.f32 1.442695, %v2090_v29 }
0x1f9e   :  { %2704 = vpow2.f32 %v2093_v30 }
0x1f9f   :  { %2706 = vpow2.f32 %v2095_v31 }
0x1fa7   :  { %v2703_v32 = vpop.eup %2702 }
0x1fa8   :  { %v2097_v34 = vsel %vm2078_vm2, %v2703_v32, 0.0 }
0x1fa9   :  { %2098 = vadd.xlane.f32.xlu0 %v2097_v34 }
0x1fab   :  { %v2705_v35 = vpop.eup %2704 }
0x1fac   :  { %v2707_v1 = vpop.eup %2706  ;;  %v2100_v36 = vsel %vm2078_vm2, %v2705_v35, 0.0 }
0x1fad   :  { %2101 = vadd.xlane.f32.xlu1 %v2100_v36  ;;  %v2103_v37 = vsel %vm2078_vm2, %v2707_v1, 0.0 }
0x1fae   :  { %2104 = vadd.xlane.f32.xlu0 %v2103_v37 }
0x2032   :  { %v2099_v38 = vpop.xlane.xlu0 %2098 }
0x2033   :  { %2708 = vrcp.f32 %v2099_v38 }
0x2036   :  { %v2102_v2 = vpop.xlane.xlu1 %2101 }
0x2037   :  { %2710 = vrcp.f32 %v2102_v2  ;;  %v2105_v39 = vpop.xlane.xlu0 %2104 }
0x2038   :  { %2712 = vrcp.f32 %v2105_v39 }
0x2040   :  { %v2709_v40 = vpop.eup %2708 }
0x2041   :  { %v2109_v41 = vmul.f32 %v2709_v40, %v2703_v32 }
0x2043   :  { %2112 = vst.msk [vmem:[%s3307_s7] sm:$0xff] %vm2078_vm2, %v2109_v41 }
0x2044   :  { %v2711_v33 = vpop.eup %2710 }
0x2045   :  { %v2713_v42 = vpop.eup %2712  ;;  %v2110_v20 = vmul.f32 %v2711_v33, %v2705_v35 }
0x2046   :  { %v2111_v43 = vmul.f32 %v2713_v42, %v2707_v1 }
0x2047   :  { %2113 = vst.msk [vmem:[%s3307_s7 + $0x8] sm:$0xff] %vm2078_vm2, %v2110_v20 }
0x2048   :  { %2114 = vst.msk [vmem:[%s3307_s7 + $0x10] sm:$0xff] %vm2078_vm2, %v2111_v43 }
0x2049   :  { %2119 = vsyncpa [#allocation4], 1 }
0x204a   :  { %2120 = vsyncpa [#allocation6], 1 }

</bundles_post_ra>
